<compile_context>
chip_gen: v5e
topology: v5e:2x2
jax: 0.10.0
libtpu: 0.0.40
codegen_flags: <defaults>
</compile_context>

<pallas_src>
import jax
import jax.numpy as jnp
from jax import lax
from jax.experimental import pallas as pl
from jax.experimental.pallas import tpu as pltpu

_EPS = 1e-8


def _make_kernel(margin: float, n: int, n_pad: int, tile: int):
    """Builds the per-tile kernel. `n` is the true (unpadded) batch size."""
    need_mask = n != n_pad  # static: skip all padding-mask math when possible

    def kernel(ii_ref, jj_ref, xi_ref, xj_ref, lab_i_ref, lab_j_ref,
               sq_i_ref, sq_j_ref, out_ref):
        t = pl.program_id(0)
        i = ii_ref[t]                                          # tile-row index
        j = jj_ref[t]                                          # tile-col index

        xi = xi_ref[...]                                       # (T, D)
        xj = xj_ref[...]                                       # (T, D)

        # Gram on the MXU, contracting the feature dim of both operands
        # (no x.T copy); f32 accumulation regardless of input dtype.
        gram = lax.dot_general(
            xi, xj, (((1,), (1,)), ((), ())),
            preferred_element_type=jnp.float32)                # (T, T)

        # ||xi||^2 + ||xj||^2 - 2<xi,xj>, clamped, then cdist + eps.
        d2 = jnp.maximum(sq_i_ref[...] + sq_j_ref[...] - 2.0 * gram, 0.0)
        dist = jnp.sqrt(d2) + _EPS                             # (T, T)

        # Float masks via multiplies (cheaper than select chains on the VPU).
        eq_f = (lab_i_ref[...] == lab_j_ref[...]).astype(jnp.float32)  # (T, T)
        if need_mask:
            row_ids = i * tile + lax.broadcasted_iota(jnp.int32, (tile, 1), 0)
            col_ids = j * tile + lax.broadcasted_iota(jnp.int32, (1, tile), 1)
            valid_f = ((row_ids < n).astype(jnp.float32)
                       * (col_ids < n).astype(jnp.float32))    # (T, T)
            same_f = eq_f * valid_f
            diff_f = valid_f - same_f
        else:
            same_f = eq_f
            diff_f = 1.0 - eq_f

        hinge = jnp.maximum(margin - dist, 0.0)
        sum_pos = jnp.sum(same_f * (dist * dist))
        sum_neg = jnp.sum(diff_f * (hinge * hinge))
        num_pos = jnp.sum(same_f)

        # Strictly-upper tiles also stand in for their (never-visited) mirror.
        factor = jnp.where(j > i, 2.0, 1.0)
        sum_pos = sum_pos * factor
        sum_neg = sum_neg * factor
        num_pos = num_pos * factor

        # Lane-dense (8, 128) partial block: lanes 0/1/2 of sublane 0 are read
        # back in the wrapper (values broadcast down sublanes — harmless).
        lane = lax.broadcasted_iota(jnp.int32, (8, 128), 1)
        out_ref[...] = jnp.where(
            lane == 0, sum_pos,
            jnp.where(lane == 1, sum_neg,
                      jnp.where(lane == 2, num_pos, 0.0)))

    return kernel


def contrastive_loss_with_batch_balancing(embeddings, labels, margin: float = 0.2,
                                          tile: int | None = None,
                                          gram_dtype=jnp.float32):
    """embeddings: [N, D] float; labels: [N] int. Returns scalar f32 loss."""
    n, d = embeddings.shape
    x = embeddings.astype(jnp.float32)
    lab = labels.astype(jnp.int32)

    # Tile choice: pad N up to a multiple of 128 (lane-dense, full MXU tiles);
    # 256x256 tiles by default for larger N (safe across v5e/v6e/v7x).
    if tile is None:
        tile = 256 if n > 256 else ((n + 127) // 128) * 128
    n_pad = ((n + tile - 1) // tile) * tile
    g = n_pad // tile
    assert tile % 8 == 0 and (tile == n_pad or tile % 128 == 0), (tile, n_pad)

    if n_pad != n:
        x = jnp.pad(x, ((0, n_pad - n), (0, 0)))
        lab = jnp.pad(lab, (0, n_pad - n))

    # Squared row-norms computed ONCE (in f32, even if gram streams bf16).
    sq = jnp.sum(x * x, axis=1, keepdims=True)                 # (n_pad, 1) f32
    x_stream = x.astype(gram_dtype)                            # streamed operand
    lab_col = lab.reshape(n_pad, 1)
    lab_row = lab.reshape(1, n_pad)
    sq_col = sq
    sq_row = sq.reshape(1, n_pad)

    # Upper-triangle tile enumeration (i-major: consecutive steps share the
    # same row block, so its DMA is deduped by the pipeline).
    pairs_i, pairs_j = [], []
    for i in range(g):
        for j in range(i, g):
            pairs_i.append(i)
            pairs_j.append(j)
    num_tiles = len(pairs_i)                                   # g*(g+1)//2
    i_idx = jnp.asarray(pairs_i, dtype=jnp.int32)
    j_idx = jnp.asarray(pairs_j, dtype=jnp.int32)

    kernel = _make_kernel(float(margin), n, n_pad, tile)

    # VMEM budget: 2 streamed operands x 2 buffers x (tile*D) + epilogue
    # temporaries; capped at 56 MiB so the config also fits v7x's 64 MiB VMEM.
    elem = 2 if gram_dtype == jnp.bfloat16 else 4
    vmem_budget = 4 * tile * d * elem + 12 * tile * tile * 4 + (4 << 20)
    vmem_limit = int(min(max(vmem_budget, 32 << 20), 56 << 20))

    grid_spec = pltpu.PrefetchScalarGridSpec(
        num_scalar_prefetch=2,
        grid=(num_tiles,),
        in_specs=[
            pl.BlockSpec((tile, d), lambda t, ii, jj: (ii[t], 0)),  # x, row tile
            pl.BlockSpec((tile, d), lambda t, ii, jj: (jj[t], 0)),  # x, col tile
            pl.BlockSpec((tile, 1), lambda t, ii, jj: (ii[t], 0)),  # labels (col view)
            pl.BlockSpec((1, tile), lambda t, ii, jj: (0, jj[t])),  # labels (row view)
            pl.BlockSpec((tile, 1), lambda t, ii, jj: (ii[t], 0)),  # sq norms (col view)
            pl.BlockSpec((1, tile), lambda t, ii, jj: (0, jj[t])),  # sq norms (row view)
        ],
        out_specs=pl.BlockSpec((8, 128), lambda t, ii, jj: (t, 0)),
    )

    partials = pl.pallas_call(
        kernel,
        out_shape=jax.ShapeDtypeStruct((num_tiles * 8, 128), jnp.float32),
        grid_spec=grid_spec,
        compiler_params=pltpu.CompilerParams(
            dimension_semantics=("parallel",),
            vmem_limit_bytes=vmem_limit),
    )(i_idx, j_idx, x_stream, x_stream, lab_col, lab_row, sq_col, sq_row)

    p = partials.reshape(num_tiles, 8, 128)
    sum_pos = jnp.sum(p[:, 0, 0])
    sum_neg = jnp.sum(p[:, 0, 1])
    num_pos = jnp.sum(p[:, 0, 2])
    num_neg = jnp.float32(n) * jnp.float32(n) - num_pos
    return sum_pos / (num_pos + _EPS) + sum_neg / (num_neg + _EPS)


def _reference_loss(embeddings, labels, margin: float = 0.2):
    """Plain-JAX reference mirroring the PyTorch module."""
    x = embeddings.astype(jnp.float32)
    d2 = jnp.sum((x[:, None, :] - x[None, :, :]) ** 2, axis=-1)
    dist = jnp.sqrt(jnp.maximum(d2, 0.0)) + _EPS
    label_matrix = (labels[None, :] == labels[:, None]).astype(jnp.float32)
    pos = label_matrix * dist ** 2
    neg = (1.0 - label_matrix) * jnp.maximum(margin - dist, 0.0) ** 2
    num_pos = label_matrix.sum()
    num_neg = (1.0 - label_matrix).sum()
    return pos.sum() / (num_pos + _EPS) + neg.sum() / (num_neg + _EPS)


if __name__ == "__main__":
    key = jax.random.PRNGKey(0)
    k1, k2, k3 = jax.random.split(key, 3)

    # Test 1: small, single-tile path (N=8 padded to 128, D=32).
    emb1 = jax.random.normal(k1, (8, 32), dtype=jnp.float32)
    lab1 = jnp.array([0, 1, 0, 1, 2, 0, 1, 2], dtype=jnp.int32)
    loss1 = jax.block_until_ready(
        contrastive_loss_with_batch_balancing(emb1, lab1, margin=0.2))
    ref1 = _reference_loss(emb1, lab1, margin=0.2)
    assert jnp.allclose(loss1, ref1, rtol=1e-4, atol=1e-5), (loss1, ref1)

    # Test 2: multi-tile triangle grid with padding + symmetry doubling
    # (N=200 padded to 256, tile=128 -> 3 upper-triangle tiles).
    emb2 = 0.5 * jax.random.normal(k2, (200, 24), dtype=jnp.float32)
    lab2 = jax.random.randint(k3, (200,), 0, 5, dtype=jnp.int32)
    loss2 = jax.block_until_ready(
        contrastive_loss_with_batch_balancing(emb2, lab2, margin=0.2, tile=128))
    ref2 = _reference_loss(emb2, lab2, margin=0.2)
    assert jnp.allclose(loss2, ref2, rtol=1e-4, atol=1e-5), (loss2, ref2)

    # Test 3: bf16-gram fast path (f32 accumulate); looser tolerance because
    # the norm-expansion distance is cancellation-sensitive in bf16.
    loss3 = jax.block_until_ready(
        contrastive_loss_with_batch_balancing(
            emb2, lab2, margin=0.2, tile=128, gram_dtype=jnp.bfloat16))
    assert jnp.allclose(loss3, ref2, rtol=5e-2, atol=1e-3), (loss3, ref2)

    print("KERNEL_OK")
</pallas_src>

<mosaic_0001>
module attributes {stable_mosaic.version = 11 : i64} {
  func.func @kernel(%arg0: i32, %arg1: memref<1xi32, #tpu.memory_space<smem>>, %arg2: memref<1xi32, #tpu.memory_space<smem>>, %arg3: memref<128x32xf32, #tpu.memory_space<vmem>>, %arg4: memref<128x32xf32, #tpu.memory_space<vmem>>, %arg5: memref<128x1xi32, #tpu.memory_space<vmem>>, %arg6: memref<1x128xi32, #tpu.memory_space<vmem>>, %arg7: memref<128x1xf32, #tpu.memory_space<vmem>>, %arg8: memref<1x128xf32, #tpu.memory_space<vmem>>, %arg9: memref<8x128xf32, #tpu.memory_space<vmem>>) attributes {dimension_semantics = [#tpu.dimension_semantics<parallel>], iteration_bounds = array<i64: 1>, scalar_prefetch = 2 : i64, scratch_operands = 0 : i64, tpu.core_type = #tpu.core_type<tc>, window_params = [{transform_indices = @transform_0, window_bounds = array<i64: 128, 32>}, {transform_indices = @transform_1, window_bounds = array<i64: 128, 32>}, {transform_indices = @transform_2, window_bounds = array<i64: 128, 1>}, {transform_indices = @transform_3, window_bounds = array<i64: 1, 128>}, {transform_indices = @transform_4, window_bounds = array<i64: 128, 1>}, {transform_indices = @transform_5, window_bounds = array<i64: 1, 128>}, {transform_indices = @transform_6, window_bounds = array<i64: 8, 128>}]} {
    %0 = arith.index_cast %arg0 : i32 to index
    %1 = memref.load %arg1[%0] : memref<1xi32, #tpu.memory_space<smem>>
    %2 = arith.index_cast %arg0 : i32 to index
    %3 = memref.load %arg2[%2] : memref<1xi32, #tpu.memory_space<smem>>
    %c0 = arith.constant 0 : index
    %c0_0 = arith.constant 0 : index
    %4 = vector.load %arg3[%c0, %c0_0] : memref<128x32xf32, #tpu.memory_space<vmem>>, vector<128x32xf32>
    %c0_1 = arith.constant 0 : index
    %c0_2 = arith.constant 0 : index
    %5 = vector.load %arg4[%c0_1, %c0_2] : memref<128x32xf32, #tpu.memory_space<vmem>>, vector<128x32xf32>
    %cst = arith.constant dense<0.000000e+00> : vector<128x128xf32>
    %6 = tpu.matmul %4, %5, %cst {dimension_numbers = #tpu.dot_dimension_numbers<[1], [1], [0], [0], [0, 0, 1, 0], [], []>} : vector<128x32xf32>, vector<128x32xf32>, vector<128x128xf32> -> vector<128x128xf32>
    %c0_3 = arith.constant 0 : index
    %c0_4 = arith.constant 0 : index
    %7 = vector.load %arg7[%c0_3, %c0_4] : memref<128x1xf32, #tpu.memory_space<vmem>>, vector<128x1xf32>
    %c0_5 = arith.constant 0 : index
    %c0_6 = arith.constant 0 : index
    %8 = vector.load %arg8[%c0_5, %c0_6] : memref<1x128xf32, #tpu.memory_space<vmem>>, vector<1x128xf32>
    %9 = vector.broadcast %7 : vector<128x1xf32> to vector<128x128xf32>
    %10 = vector.broadcast %8 : vector<1x128xf32> to vector<128x128xf32>
    %11 = arith.addf %9, %10 : vector<128x128xf32>
    %cst_7 = arith.constant 2.000000e+00 : f32
    %12 = vector.broadcast %cst_7 : f32 to vector<128x128xf32>
    %13 = arith.mulf %12, %6 : vector<128x128xf32>
    %14 = arith.subf %11, %13 : vector<128x128xf32>
    %cst_8 = arith.constant 0.000000e+00 : f32
    %15 = vector.broadcast %cst_8 : f32 to vector<128x128xf32>
    %16 = arith.maximumf %14, %15 : vector<128x128xf32>
    %17 = math.sqrt %16 : vector<128x128xf32>
    %cst_9 = arith.constant 9.99999993E-9 : f32
    %18 = vector.broadcast %cst_9 : f32 to vector<128x128xf32>
    %19 = arith.addf %17, %18 : vector<128x128xf32>
    %c0_10 = arith.constant 0 : index
    %c0_11 = arith.constant 0 : index
    %20 = vector.load %arg5[%c0_10, %c0_11] : memref<128x1xi32, #tpu.memory_space<vmem>>, vector<128x1xi32>
    %c0_12 = arith.constant 0 : index
    %c0_13 = arith.constant 0 : index
    %21 = vector.load %arg6[%c0_12, %c0_13] : memref<1x128xi32, #tpu.memory_space<vmem>>, vector<1x128xi32>
    %22 = vector.broadcast %20 : vector<128x1xi32> to vector<128x128xi32>
    %23 = vector.broadcast %21 : vector<1x128xi32> to vector<128x128xi32>
    %24 = arith.cmpi eq, %22, %23 : vector<128x128xi32>
    %25 = arith.extui %24 : vector<128x128xi1> to vector<128x128xi32>
    %26 = arith.sitofp %25 : vector<128x128xi32> to vector<128x128xf32>
    %c128_i32 = arith.constant 128 : i32
    %27 = arith.muli %1, %c128_i32 : i32
    %28 = tpu.iota {dimensions = array<i32: 0>} : vector<128x1xi32>
    %29 = vector.broadcast %27 : i32 to vector<128x1xi32>
    %30 = arith.addi %29, %28 : vector<128x1xi32>
    %c128_i32_14 = arith.constant 128 : i32
    %31 = arith.muli %3, %c128_i32_14 : i32
    %32 = tpu.iota {dimensions = array<i32: 1>} : vector<1x128xi32>
    %33 = vector.broadcast %31 : i32 to vector<1x128xi32>
    %34 = arith.addi %33, %32 : vector<1x128xi32>
    %c8_i32 = arith.constant 8 : i32
    %35 = vector.broadcast %c8_i32 : i32 to vector<128x1xi32>
    %36 = arith.cmpi slt, %30, %35 : vector<128x1xi32>
    %37 = arith.extui %36 : vector<128x1xi1> to vector<128x1xi32>
    %38 = arith.sitofp %37 : vector<128x1xi32> to vector<128x1xf32>
    %c8_i32_15 = arith.constant 8 : i32
    %39 = vector.broadcast %c8_i32_15 : i32 to vector<1x128xi32>
    %40 = arith.cmpi slt, %34, %39 : vector<1x128xi32>
    %41 = arith.extui %40 : vector<1x128xi1> to vector<1x128xi32>
    %42 = arith.sitofp %41 : vector<1x128xi32> to vector<1x128xf32>
    %43 = vector.broadcast %38 : vector<128x1xf32> to vector<128x128xf32>
    %44 = vector.broadcast %42 : vector<1x128xf32> to vector<128x128xf32>
    %45 = arith.mulf %43, %44 : vector<128x128xf32>
    %46 = arith.mulf %26, %45 : vector<128x128xf32>
    %47 = arith.subf %45, %46 : vector<128x128xf32>
    %cst_16 = arith.constant 2.000000e-01 : f32
    %48 = vector.broadcast %cst_16 : f32 to vector<128x128xf32>
    %49 = arith.subf %48, %19 : vector<128x128xf32>
    %cst_17 = arith.constant 0.000000e+00 : f32
    %50 = vector.broadcast %cst_17 : f32 to vector<128x128xf32>
    %51 = arith.maximumf %49, %50 : vector<128x128xf32>
    %52 = arith.mulf %19, %19 : vector<128x128xf32>
    %53 = arith.mulf %46, %52 : vector<128x128xf32>
    %54 = vector.shape_cast %53 : vector<128x128xf32> to vector<1x128x128xf32>
    %cst_18 = arith.constant dense<0.000000e+00> : vector<1xf32>
    %55 = vector.multi_reduction <add>, %54, %cst_18 [1, 2] : vector<1x128x128xf32> to vector<1xf32>
    %56 = vector.shape_cast %55 : vector<1xf32> to vector<1x1x1xf32>
    %57 = vector.extract %56[0, 0, 0] : f32 from vector<1x1x1xf32>
    %58 = arith.mulf %51, %51 : vector<128x128xf32>
    %59 = arith.mulf %47, %58 : vector<128x128xf32>
    %60 = vector.shape_cast %59 : vector<128x128xf32> to vector<1x128x128xf32>
    %cst_19 = arith.constant dense<0.000000e+00> : vector<1xf32>
    %61 = vector.multi_reduction <add>, %60, %cst_19 [1, 2] : vector<1x128x128xf32> to vector<1xf32>
    %62 = vector.shape_cast %61 : vector<1xf32> to vector<1x1x1xf32>
    %63 = vector.extract %62[0, 0, 0] : f32 from vector<1x1x1xf32>
    %64 = vector.shape_cast %46 : vector<128x128xf32> to vector<1x128x128xf32>
    %cst_20 = arith.constant dense<0.000000e+00> : vector<1xf32>
    %65 = vector.multi_reduction <add>, %64, %cst_20 [1, 2] : vector<1x128x128xf32> to vector<1xf32>
    %66 = vector.shape_cast %65 : vector<1xf32> to vector<1x1x1xf32>
    %67 = vector.extract %66[0, 0, 0] : f32 from vector<1x1x1xf32>
    %68 = arith.cmpi sgt, %3, %1 : i32
    %cst_21 = arith.constant 2.000000e+00 : f32
    %cst_22 = arith.constant 1.000000e+00 : f32
    %69 = arith.select %68, %cst_21, %cst_22 : f32
    %70 = arith.mulf %57, %69 : f32
    %71 = arith.mulf %63, %69 : f32
    %72 = arith.mulf %67, %69 : f32
    %73 = tpu.iota {dimensions = array<i32: 1>} : vector<8x128xi32>
    %c0_i32 = arith.constant 0 : i32
    %74 = vector.broadcast %c0_i32 : i32 to vector<8x128xi32>
    %75 = arith.cmpi eq, %73, %74 : vector<8x128xi32>
    %c1_i32 = arith.constant 1 : i32
    %76 = vector.broadcast %c1_i32 : i32 to vector<8x128xi32>
    %77 = arith.cmpi eq, %73, %76 : vector<8x128xi32>
    %c2_i32 = arith.constant 2 : i32
    %78 = vector.broadcast %c2_i32 : i32 to vector<8x128xi32>
    %79 = arith.cmpi eq, %73, %78 : vector<8x128xi32>
    %cst_23 = arith.constant 0.000000e+00 : f32
    %80 = vector.broadcast %72 : f32 to vector<8x128xf32>
    %81 = vector.broadcast %cst_23 : f32 to vector<8x128xf32>
    %82 = arith.select %79, %80, %81 : vector<8x128xi1>, vector<8x128xf32>
    %83 = vector.broadcast %71 : f32 to vector<8x128xf32>
    %84 = arith.select %77, %83, %82 : vector<8x128xi1>, vector<8x128xf32>
    %85 = vector.broadcast %70 : f32 to vector<8x128xf32>
    %86 = arith.select %75, %85, %84 : vector<8x128xi1>, vector<8x128xf32>
    %c0_24 = arith.constant 0 : index
    %c0_25 = arith.constant 0 : index
    %87 = vector.load %arg9[%c0_24, %c0_25] : memref<8x128xf32, #tpu.memory_space<vmem>>, vector<8x128xf32>
    tpu.vector_store %arg9[%c0_24, %c0_25], %86 {strides = array<i32>} : memref<8x128xf32, #tpu.memory_space<vmem>>, vector<8x128xf32>,
    return
  }
  func.func @transform_0(%arg0: i32, %arg1: memref<1xi32, #tpu.memory_space<smem>>, %arg2: memref<1xi32, #tpu.memory_space<smem>>) -> (i32, i32) {
    %0 = arith.index_cast %arg0 : i32 to index
    %1 = memref.load %arg1[%0] : memref<1xi32, #tpu.memory_space<smem>>
    %c0_i32 = arith.constant 0 : i32
    %c0_i32_0 = arith.constant 0 : i32
    return %1, %c0_i32 : i32, i32
  }
  func.func @transform_1(%arg0: i32, %arg1: memref<1xi32, #tpu.memory_space<smem>>, %arg2: memref<1xi32, #tpu.memory_space<smem>>) -> (i32, i32) {
    %0 = arith.index_cast %arg0 : i32 to index
    %1 = memref.load %arg2[%0] : memref<1xi32, #tpu.memory_space<smem>>
    %c0_i32 = arith.constant 0 : i32
    %c0_i32_0 = arith.constant 0 : i32
    return %1, %c0_i32 : i32, i32
  }
  func.func @transform_2(%arg0: i32, %arg1: memref<1xi32, #tpu.memory_space<smem>>, %arg2: memref<1xi32, #tpu.memory_space<smem>>) -> (i32, i32) {
    %0 = arith.index_cast %arg0 : i32 to index
    %1 = memref.load %arg1[%0] : memref<1xi32, #tpu.memory_space<smem>>
    %c0_i32 = arith.constant 0 : i32
    %c0_i32_0 = arith.constant 0 : i32
    return %1, %c0_i32 : i32, i32
  }
  func.func @transform_3(%arg0: i32, %arg1: memref<1xi32, #tpu.memory_space<smem>>, %arg2: memref<1xi32, #tpu.memory_space<smem>>) -> (i32, i32) {
    %0 = arith.index_cast %arg0 : i32 to index
    %1 = memref.load %arg2[%0] : memref<1xi32, #tpu.memory_space<smem>>
    %c0_i32 = arith.constant 0 : i32
    %c0_i32_0 = arith.constant 0 : i32
    return %c0_i32, %1 : i32, i32
  }
  func.func @transform_4(%arg0: i32, %arg1: memref<1xi32, #tpu.memory_space<smem>>, %arg2: memref<1xi32, #tpu.memory_space<smem>>) -> (i32, i32) {
    %0 = arith.index_cast %arg0 : i32 to index
    %1 = memref.load %arg1[%0] : memref<1xi32, #tpu.memory_space<smem>>
    %c0_i32 = arith.constant 0 : i32
    %c0_i32_0 = arith.constant 0 : i32
    return %1, %c0_i32 : i32, i32
  }
  func.func @transform_5(%arg0: i32, %arg1: memref<1xi32, #tpu.memory_space<smem>>, %arg2: memref<1xi32, #tpu.memory_space<smem>>) -> (i32, i32) {
    %0 = arith.index_cast %arg0 : i32 to index
    %1 = memref.load %arg2[%0] : memref<1xi32, #tpu.memory_space<smem>>
    %c0_i32 = arith.constant 0 : i32
    %c0_i32_0 = arith.constant 0 : i32
    return %c0_i32, %1 : i32, i32
  }
  func.func @transform_6(%arg0: i32, %arg1: memref<1xi32, #tpu.memory_space<smem>>, %arg2: memref<1xi32, #tpu.memory_space<smem>>) -> (i32, i32) {
    %c0_i32 = arith.constant 0 : i32
    %c0_i32_0 = arith.constant 0 : i32
    return %arg0, %c0_i32 : i32, i32
  }
}

</mosaic_0001>

<bundles_post_ra>
// kernel: tpu_custom_call.1
= control target key start
LH: loop header
LB: loop body
LE: loop exit
PB: predicated region body
PF: predicated region fallthrough
CT: control target
= control target key end

     0   :  { %s2322_s0 = inlined_call_operand.<no memory space> [shape: s32[1], index: 0, kind: input, shape index: {}]   ;;  %s2323_s1 = inlined_call_operand.<no memory space> [shape: s32[1], index: 1, kind: input, shape index: {}]   ;;  %s2324_s2 = inlined_call_operand.vmem [shape: f32[128,32], index: 2, kind: input, shape index: {}]   ;;  %s2325_s3 = inlined_call_operand.vmem [shape: f32[128,32], index: 3, kind: input, shape index: {}]   ;;  %s2326_s4 = inlined_call_operand.vmem [shape: s32[128,1], index: 4, kind: input, shape index: {}]   ;;  %s2327_s5 = inlined_call_operand.vmem [shape: s32[1,128], index: 5, kind: input, shape index: {}]   ;;  %s2328_s6 = inlined_call_operand.vmem [shape: f32[128,1], index: 6, kind: input, shape index: {}]   ;;  %s2329_s7 = inlined_call_operand.vmem [shape: f32[1,128], index: 7, kind: input, shape index: {}]   ;;  %s2330_s8 = inlined_call_operand.hbm [shape: f32[8,128], index: 8, kind: output, shape index: {}]  }
   0x1   :  { %s1196_s29 = sshll.u32 %s2323_s1, 4  ;;  %s1194_s10 = sshll.u32 %s2322_s0, 4 }
   0x2   :  { %15 = vsyncpa [#allocation6], 0  ;;  %v1389_v0 = vmov 0   ;;  %p112_p0 = scmp.lt.s32.totalorder %s1196_s29, 15  ;;  %p104_p1 = scmp.lt.s32.totalorder %s1194_s10, 15  ;;  %vm178_vm0 = vcmask 261120  }
   0x3   :  { %1327 = vset.pattern.permute.xlu1 %v1389_v0  ;;  %1326 = vset.pattern.permute.xlu0 %v1389_v0  ;;  %p127_p2 = scmp.lt.s32.totalorder %s2323_s1, 0  ;;  %s1250_s13 = sshll.u32 %s2322_s0, 7 }
   0x4   :  { %1328 = vset.pattern.permute.xlu2 %v1389_v0  ;;  %s2406_s29 = smov (!%p112_p0, %s1196_s29), 15  ;;  %s2408_s10 = smov (!%p104_p1, %s1194_s10), 15 }
   0x5   :  { %s1197_s11 = sshll.u32 %s2406_s29, 3  ;;  %s1448_s15 = sshll.u32 %s2408_s10, 3 }
   0x6   :  { %s1446_s14 = scalar_lea.vmem %s2325_s3, %s1197_s11  ;;  %s1455_s18 = scalar_lea.vmem %s2328_s6, %s1448_s15 }
   0x7   :  { %v177_v1 = vld [vmem:[%s1446_s14 + $0x78] sm:$0xff]  ;;  %v342_v2 = vld [vmem:[%s1455_s18 + $0x10] sm:$0xff]  ;;  %v340_v3 = vld [vmem:[%s1455_s18] sm:$0xff]  ;;  %s1470_s21 = scalar_select %p127_p2, %s2323_s1, 0 }
   0x8   :  { %1202 = vmatpush.xpose.msk.msra.mxu0 %vm178_vm0, %v177_v1  ;;  %1269 = vmatpush.xpose.msk.msra.mxu1 %vm178_vm0, %v177_v1  ;;  %v176_v4 = vld [vmem:[%s1446_s14 + $0x70] sm:$0xff]  ;;  %v344_v5 = vld [vmem:[%s1455_s18 + $0x20] sm:$0xff]  ;;  %v175_v6 = vld [vmem:[%s1446_s14 + $0x68] sm:$0xff]  ;;  %s1539_s30 = scalar_lea.vmem %s2326_s4, %s1448_s15  ;;  %s1581_s10 = scalar_lea.vmem %s2324_s2, %s1448_s15 }
   0x9   :  { %1270 = vmatpush.xpose.msk.msra.mxu2 %vm178_vm0, %v177_v1  ;;  %1271 = vmatpush.xpose.msk.msra.mxu3 %vm178_vm0, %v177_v1  ;;  %s142_s24 = scalar_lea.vmem %s2329_s7, %s1470_s21  ;;  %v343_v7 = vld [vmem:[%s1455_s18 + $0x18] sm:$0xff]  ;;  %v341_v8 = vld [vmem:[%s1455_s18 + $0x8] sm:$0xff]  ;;  %v174_v9 = vld [vmem:[%s1446_s14 + $0x60] sm:$0xff]  ;;  %s129_s27 = scalar_lea.vmem %s2327_s5, %s1470_s21 }
   0xa   :  { %369 = vperm.xlu1 %1327, %v342_v2   ;;  %359 = vperm.xlu0 %1326, %v340_v3   ;;  %v345_v10 = vld [vmem:[%s1455_s18 + $0x28] sm:$0xff]  ;;  %v173_v11 = vld [vmem:[%s1446_s14 + $0x58] sm:$0xff]  ;;  %v346_v13 = vld [vmem:[%s1455_s18 + $0x30] sm:$0xff]  ;;  %s1251_s16 = sshll.u32 %s2323_s1, 7  ;;  %p1133_p3 = scmp.gt.s32.totalorder %s2323_s1, %s2322_s0 }
   0xb   :  { %379 = vperm.xlu2 %1328, %v344_v5   ;;  %v347_v12 = vld [vmem:[%s1455_s18 + $0x38] sm:$0xff]  ;;  %v172_v14 = vld [vmem:[%s1446_s14 + $0x50] sm:$0xff]  ;;  %v348_v15 = vld [vmem:[%s1455_s18 + $0x40] sm:$0xff]  ;;  %s1155_s4 = sshll.u32 %s2330_s8, 4  ;;  %s1156_s4 = int_to_ptr.hbm [resolvable:$true] %s1155_s4 }
   0xc   :  { %1203 = vmatpush.xpose.msk.msra.mxu0 %vm178_vm0, %v176_v4  ;;  %1272 = vmatpush.xpose.msk.msra.mxu1 %vm178_vm0, %v176_v4  ;;  %v171_v16 = vld [vmem:[%s1446_s14 + $0x48] sm:$0xff]  ;;  %v350_v17 = vld [vmem:[%s1455_s18 + $0x50] sm:$0xff]  ;;  %v170_v19 = vld [vmem:[%s1446_s14 + $0x40] sm:$0xff]  ;;  %s1134_s6 = scalar_select %p1133_p3, 2.0, 1.0 }
   0xd   :  { %1273 = vmatpush.xpose.msk.msra.mxu2 %vm178_vm0, %v176_v4  ;;  %1274 = vmatpush.xpose.msk.msra.mxu3 %vm178_vm0, %v176_v4  ;;  %v349_v18 = vld [vmem:[%s1455_s18 + $0x48] sm:$0xff]  ;;  %v351_v20 = vld [vmem:[%s1455_s18 + $0x58] sm:$0xff]  ;;  %v352_v23 = vld [vmem:[%s1455_s18 + $0x60] sm:$0xff] }
   0xe   :  { %v169_v21 = vld [vmem:[%s1446_s14 + $0x38] sm:$0xff]  ;;  %v353_v22 = vld [vmem:[%s1455_s18 + $0x68] sm:$0xff]  ;;  %v168_v24 = vld [vmem:[%s1446_s14 + $0x30] sm:$0xff] }
   0xf   :  { %v354_v25 = vld [vmem:[%s1455_s18 + $0x70] sm:$0xff]  ;;  %v167_v26 = vld [vmem:[%s1446_s14 + $0x28] sm:$0xff]  ;;  %v355_v27 = vld [vmem:[%s1455_s18 + $0x78] sm:$0xff] }
  0x10   :  { %1204 = vmatpush.xpose.msk.msra.mxu0 %vm178_vm0, %v175_v6  ;;  %1275 = vmatpush.xpose.msk.msra.mxu1 %vm178_vm0, %v175_v6  ;;  %v712_v28 = vld [vmem:[%s1539_s30] sm:$0xff]  ;;  %v713_v30 = vld [vmem:[%s1539_s30 + $0x8] sm:$0xff]  ;;  %v165_v31 = vld [vmem:[%s1446_s14 + $0x18] sm:$0xff] }
  0x11   :  { %1276 = vmatpush.xpose.msk.msra.mxu2 %vm178_vm0, %v175_v6  ;;  %1277 = vmatpush.xpose.msk.msra.mxu3 %vm178_vm0, %v175_v6  ;;  %v166_v29 = vld [vmem:[%s1446_s14 + $0x20] sm:$0xff]  ;;  %v714_v32 = vld [vmem:[%s1539_s30 + $0x10] sm:$0xff]  ;;  %v715_v33 = vld [vmem:[%s1539_s30 + $0x18] sm:$0xff] }
  0x12   :  { %374 = vperm.xlu1 %1327, %v343_v7   ;;  %364 = vperm.xlu0 %1326, %v341_v8   ;;  %v164_v34 = vld [vmem:[%s1446_s14 + $0x10] sm:$0xff]  ;;  %v716_v35 = vld [vmem:[%s1539_s30 + $0x20] sm:$0xff]  ;;  %v163_v36 = vld [vmem:[%s1446_s14 + $0x8] sm:$0xff] }
  0x13   :  { %384 = vperm.xlu2 %1328, %v345_v10   ;;  %v717_v37 = vld [vmem:[%s1539_s30 + $0x28] sm:$0xff]  ;;  %v718_v38 = vld [vmem:[%s1539_s30 + $0x30] sm:$0xff]  ;;  %v162_v39 = vld [vmem:[%s1446_s14] sm:$0xff] }
  0x14   :  { %1205 = vmatpush.xpose.msk.msra.mxu0 %vm178_vm0, %v174_v9  ;;  %1278 = vmatpush.xpose.msk.msra.mxu1 %vm178_vm0, %v174_v9  ;;  %v719_v40 = vld [vmem:[%s1539_s30 + $0x38] sm:$0xff]  ;;  %v146_v41 = vld [vmem:[%s1581_s10] sm:$0xff]  ;;  %v721_v46 = vld [vmem:[%s1539_s30 + $0x48] sm:$0xff] }
  0x15   :  { %1279 = vmatpush.xpose.msk.msra.mxu2 %vm178_vm0, %v174_v9  ;;  %1280 = vmatpush.xpose.msk.msra.mxu3 %vm178_vm0, %v174_v9  ;;  %v150_v42 = vld [vmem:[%s1581_s10 + $0x20] sm:$0xff]  ;;  %v722_v47 = vld [vmem:[%s1539_s30 + $0x50] sm:$0xff]  ;;  %v147_v48 = vld [vmem:[%s1581_s10 + $0x8] sm:$0xff] }
  0x16   :  { %v154_v43 = vld [vmem:[%s1581_s10 + $0x40] sm:$0xff]  ;;  %v151_v49 = vld [vmem:[%s1581_s10 + $0x28] sm:$0xff]  ;;  %v723_v52 = vld [vmem:[%s1539_s30 + $0x58] sm:$0xff] }
  0x17   :  { %v158_v44 = vld [vmem:[%s1581_s10 + $0x60] sm:$0xff]  ;;  %v155_v50 = vld [vmem:[%s1581_s10 + $0x48] sm:$0xff]  ;;  %v148_v55 = vld [vmem:[%s1581_s10 + $0x10] sm:$0xff] }
  0x18   :  { %1206 = vmatpush.xpose.msk.msra.mxu0 %vm178_vm0, %v173_v11  ;;  %1281 = vmatpush.xpose.msk.msra.mxu1 %vm178_vm0, %v173_v11  ;;  %v720_v45 = vld [vmem:[%s1539_s30 + $0x40] sm:$0xff]  ;;  %v159_v51 = vld [vmem:[%s1581_s10 + $0x68] sm:$0xff]  ;;  %v152_v56 = vld [vmem:[%s1581_s10 + $0x30] sm:$0xff] }
  0x19   :  { %1282 = vmatpush.xpose.msk.msra.mxu2 %vm178_vm0, %v173_v11  ;;  %1283 = vmatpush.xpose.msk.msra.mxu3 %vm178_vm0, %v173_v11  ;;  %v724_v53 = vld [vmem:[%s1539_s30 + $0x60] sm:$0xff]  ;;  %v725_v54 = vld [vmem:[%s1539_s30 + $0x68] sm:$0xff]  ;;  %v156_v57 = vld [vmem:[%s1581_s10 + $0x50] sm:$0xff] }
  0x1a   :  { %394 = vperm.xlu1 %1327, %v347_v12   ;;  %389 = vperm.xlu0 %1326, %v346_v13   ;;  %v160_v58 = vld [vmem:[%s1581_s10 + $0x70] sm:$0xff]  ;;  %v727_v60 = vld [vmem:[%s1539_s30 + $0x78] sm:$0xff]  ;;  %v1633_v1 = vld [vmem:[%s142_s24] ss:$0 sm:$0xff] }
  0x1b   :  { %399 = vperm.xlu2 %1328, %v348_v15   ;;  %v726_v59 = vld [vmem:[%s1539_s30 + $0x70] sm:$0xff]  ;;  %v149_v61 = vld [vmem:[%s1581_s10 + $0x18] sm:$0xff] }
  0x1c   :  { %1207 = vmatpush.xpose.msk.msra.mxu0 %vm178_vm0, %v172_v14  ;;  %1284 = vmatpush.xpose.msk.msra.mxu1 %vm178_vm0, %v172_v14  ;;  %v153_v62 = vld [vmem:[%s1581_s10 + $0x38] sm:$0xff] }
  0x1d   :  { %1285 = vmatpush.xpose.msk.msra.mxu2 %vm178_vm0, %v172_v14  ;;  %1286 = vmatpush.xpose.msk.msra.mxu3 %vm178_vm0, %v172_v14  ;;  %v157_v63 = vld [vmem:[%s1581_s10 + $0x58] sm:$0xff] }
  0x1e   :  { %v161_v0 = vld [vmem:[%s1581_s10 + $0x78] sm:$0xff] }
  0x20   :  { %1208 = vmatpush.xpose.msk.msra.mxu0 %vm178_vm0, %v171_v16  ;;  %1287 = vmatpush.xpose.msk.msra.mxu1 %vm178_vm0, %v171_v16 }
  0x21   :  { %1288 = vmatpush.xpose.msk.msra.mxu2 %vm178_vm0, %v171_v16  ;;  %1289 = vmatpush.xpose.msk.msra.mxu3 %vm178_vm0, %v171_v16 }
  0x22   :  { %409 = vperm.xlu1 %1327, %v350_v17   ;;  %404 = vperm.xlu0 %1326, %v349_v18  }
  0x23   :  { %414 = vperm.xlu2 %1328, %v351_v20  }
  0x24   :  { %1209 = vmatpush.xpose.msk.msra.mxu0 %vm178_vm0, %v170_v19  ;;  %1290 = vmatpush.xpose.msk.msra.mxu1 %vm178_vm0, %v170_v19 }
  0x25   :  { %1291 = vmatpush.xpose.msk.msra.mxu2 %vm178_vm0, %v170_v19  ;;  %1292 = vmatpush.xpose.msk.msra.mxu3 %vm178_vm0, %v170_v19 }
  0x28   :  { %1210 = vmatpush.xpose.msk.msra.mxu0 %vm178_vm0, %v169_v21  ;;  %1293 = vmatpush.xpose.msk.msra.mxu1 %vm178_vm0, %v169_v21 }
  0x29   :  { %1294 = vmatpush.xpose.msk.msra.mxu2 %vm178_vm0, %v169_v21  ;;  %1295 = vmatpush.xpose.msk.msra.mxu3 %vm178_vm0, %v169_v21 }
  0x2a   :  { %424 = vperm.xlu1 %1327, %v353_v22   ;;  %419 = vperm.xlu0 %1326, %v352_v23  }
  0x2b   :  { %429 = vperm.xlu2 %1328, %v354_v25  }
  0x2c   :  { %1211 = vmatpush.xpose.msk.msra.mxu0 %vm178_vm0, %v168_v24  ;;  %1296 = vmatpush.xpose.msk.msra.mxu1 %vm178_vm0, %v168_v24 }
  0x2d   :  { %1297 = vmatpush.xpose.msk.msra.mxu2 %vm178_vm0, %v168_v24  ;;  %1298 = vmatpush.xpose.msk.msra.mxu3 %vm178_vm0, %v168_v24  ;;  %v827_v24 = vlaneseq }
  0x2f   :  { %v1671_v25 = vshrl.u32 %v827_v24, 7 }
  0x30   :  { %1212 = vmatpush.xpose.msk.msra.mxu0 %vm178_vm0, %v167_v26  ;;  %1299 = vmatpush.xpose.msk.msra.mxu1 %vm178_vm0, %v167_v26 }
  0x31   :  { %1300 = vmatpush.xpose.msk.msra.mxu2 %vm178_vm0, %v167_v26  ;;  %1301 = vmatpush.xpose.msk.msra.mxu3 %vm178_vm0, %v167_v26 }
  0x32   :  { %434 = vperm.xlu0 %1326, %v355_v27   ;;  %730 = vperm.xlu1 %1327, %v712_v28   ;;  %v1676_v28 = vand.u32 127, %v827_v24 }
  0x33   :  { %733 = vperm.xlu2 %1328, %v713_v30  }
  0x34   :  { %1213 = vmatpush.xpose.msk.msra.mxu0 %vm178_vm0, %v166_v29  ;;  %1302 = vmatpush.xpose.msk.msra.mxu1 %vm178_vm0, %v166_v29  ;;  %2352 = vst [vmem:[#allocation9_spill] sm:$0xff] %v1676_v28 }
  0x35   :  { %1303 = vmatpush.xpose.msk.msra.mxu2 %vm178_vm0, %v166_v29  ;;  %1304 = vmatpush.xpose.msk.msra.mxu3 %vm178_vm0, %v166_v29 }
  0x38   :  { %1214 = vmatpush.xpose.msk.msra.mxu0 %vm178_vm0, %v165_v31  ;;  %1305 = vmatpush.xpose.msk.msra.mxu1 %vm178_vm0, %v165_v31 }
  0x39   :  { %1306 = vmatpush.xpose.msk.msra.mxu2 %vm178_vm0, %v165_v31  ;;  %1307 = vmatpush.xpose.msk.msra.mxu3 %vm178_vm0, %v165_v31  ;;  %v1684_v31 = vstv %s1250_s13 }
  0x3a   :  { %736 = vperm.xlu0 %1326, %v714_v32   ;;  %739 = vperm.xlu1 %1327, %v715_v33   ;;  %v864_v32 = vstv %s1251_s16  ;;  %v829_v33 = vadd.s32 8, %v1671_v25 }
  0x3b   :  { %742 = vperm.xlu2 %1328, %v716_v35   ;;  %v865_v35 = vadd.s32 %v864_v32, %v1676_v28  ;;  %v837_v32 = vadd.s32 72, %v1671_v25 }
  0x3c   :  { %1215 = vmatpush.xpose.msk.msra.mxu0 %vm178_vm0, %v164_v34  ;;  %1308 = vmatpush.xpose.msk.msra.mxu1 %vm178_vm0, %v164_v34 }
  0x3d   :  { %1309 = vmatpush.xpose.msk.msra.mxu2 %vm178_vm0, %v164_v34  ;;  %1310 = vmatpush.xpose.msk.msra.mxu3 %vm178_vm0, %v164_v34  ;;  %v845_v34 = vadd.s32 %v1684_v31, %v1671_v25  ;;  %vm914_vm2 = vcmp.lt.s32.totalorder %v865_v35, 8  ;;  %v838_v35 = vadd.s32 80, %v1671_v25 }
  0x3f   :  { %vm866_vm1 = vcmp.lt.s32.totalorder %v845_v34, 8 }
  0x40   :  { %1216 = vmatpush.xpose.msk.msra.mxu0 %vm178_vm0, %v163_v36  ;;  %1311 = vmatpush.xpose.msk.msra.mxu1 %vm178_vm0, %v163_v36 }
  0x41   :  { %1312 = vmatpush.xpose.msk.msra.mxu2 %vm178_vm0, %v163_v36  ;;  %1313 = vmatpush.xpose.msk.msra.mxu3 %vm178_vm0, %v163_v36  ;;  %v846_v36 = vadd.s32 %v1684_v31, %v829_v33 }
  0x42   :  { %745 = vperm.xlu0 %1326, %v717_v37   ;;  %748 = vperm.xlu1 %1327, %v718_v38  }
  0x43   :  { %751 = vperm.xlu2 %1328, %v719_v40   ;;  %v830_v40 = vadd.s32 16, %v1671_v25  ;;  %vm867_vm3 = vcmp.lt.s32.totalorder %v846_v36, 8 }
  0x44   :  { %1217 = vmatpush.xpose.msk.msra.mxu0 %vm178_vm0, %v162_v39  ;;  %1314 = vmatpush.xpose.msk.msra.mxu1 %vm178_vm0, %v162_v39 }
  0x45   :  { %1315 = vmatpush.xpose.msk.msra.mxu2 %vm178_vm0, %v162_v39  ;;  %1316 = vmatpush.xpose.msk.msra.mxu3 %vm178_vm0, %v162_v39 }
  0x47   :  { %1218 = vmatmul.msk.f32.vlgmr.msra.gmra.mxu0 %vm178_vm0, %v146_v41  ;;  %1222 = vmatmul.msk.f32.vlgmr.msra.gmra.mxu1 %vm178_vm0, %v150_v42 }
  0x48   :  { %1226 = vmatmul.msk.f32.vlgmr.msra.gmra.mxu2 %vm178_vm0, %v154_v43  ;;  %1230 = vmatmul.msk.f32.vlgmr.msra.gmra.mxu3 %vm178_vm0, %v158_v44  ;;  %v831_v43 = vadd.s32 24, %v1671_v25  ;;  %v832_v44 = vadd.s32 32, %v1671_v25 }
  0x4a   :  { %754 = vperm.xlu0 %1326, %v720_v45   ;;  %757 = vperm.xlu1 %1327, %v721_v46   ;;  %v1705_v45 = vld [vmem:[%s129_s27] ss:$0 sm:$0xff]  ;;  %v1390_v46 = vmov 0.0   ;;  %s1391_s27 = smov [#allocation5]  }
  0x4b   :  { %760 = vperm.xlu2 %1328, %v722_v47   ;;  %v1252_v47 = vsel %vm866_vm1, 1.0, %v1390_v46  ;;  %s1153_s28 = sshll.u32 %s1391_s27, 4  ;;  %s1154_s28 = int_to_ptr.vmem [resolvable:$true] %s1153_s28 }
  0x4f   :  { %1219 = vmatmul.msk.f32.gmra.mxu0 %vm178_vm0, %v147_v48  ;;  %1223 = vmatmul.msk.f32.gmra.mxu1 %vm178_vm0, %v151_v49  ;;  %v1709_v48 = vsel %vm914_vm2, 1.0, %v1390_v46  ;;  %v847_v49 = vadd.s32 %v1684_v31, %v830_v40 }
  0x50   :  { %1227 = vmatmul.msk.f32.gmra.mxu2 %vm178_vm0, %v155_v50  ;;  %1231 = vmatmul.msk.f32.gmra.mxu3 %vm178_vm0, %v159_v51  ;;  %v1253_v50 = vsel %vm867_vm3, 1.0, %v1390_v46  ;;  %v848_v51 = vadd.s32 %v1684_v31, %v831_v43 }
  0x51   :  { %vm868_vm5 = vcmp.lt.s32.totalorder %v847_v49, 8 }
  0x52   :  { %763 = vperm.xlu0 %1326, %v723_v52   ;;  %766 = vperm.xlu1 %1327, %v724_v53   ;;  %v849_v52 = vadd.s32 %v1684_v31, %v832_v44  ;;  %v1716_v53 = vmul.f32 %v1709_v48, %v1252_v47  ;;  %vm869_vm7 = vcmp.lt.s32.totalorder %v848_v51, 8  ;;  %v855_v51 = vadd.s32 %v1684_v31, %v838_v35 }
  0x53   :  { %769 = vperm.xlu2 %1328, %v725_v54  }
  0x54   :  { %vm870_vm8 = vcmp.lt.s32.totalorder %v849_v52, 8 }
  0x57   :  { %1220 = vmatmul.msk.f32.gmra.mxu0 %vm178_vm0, %v148_v55  ;;  %1224 = vmatmul.msk.f32.gmra.mxu1 %vm178_vm0, %v152_v56  ;;  %v1720_v56 = vmul.f32 %v1709_v48, %v1253_v50  ;;  %v854_v50 = vadd.s32 %v1684_v31, %v837_v32 }
  0x58   :  { %1228 = vmatmul.msk.f32.gmra.mxu2 %vm178_vm0, %v156_v57  ;;  %1232 = vmatmul.msk.f32.gmra.mxu3 %vm178_vm0, %v160_v58  ;;  %v833_v57 = vadd.s32 40, %v1671_v25  ;;  %v834_v58 = vadd.s32 48, %v1671_v25 }
  0x59   :  { %vm875_vm3 = vcmp.lt.s32.totalorder %v854_v50, 8  ;;  %v842_v50 = vadd.s32 112, %v1671_v25 }
  0x5a   :  { %772 = vperm.xlu0 %1326, %v726_v59   ;;  %775 = vperm.xlu1 %1327, %v727_v60  }
  0x5f   :  { %1221 = vmatmul.msk.f32.gmra.mxu0 %vm178_vm0, %v149_v61  ;;  %1225 = vmatmul.msk.f32.gmra.mxu1 %vm178_vm0, %v153_v62 }
  0x60   :  { %1229 = vmatmul.msk.f32.gmra.mxu2 %vm178_vm0, %v157_v63  ;;  %1233 = vmatmul.msk.f32.gmra.mxu3 %vm178_vm0, %v161_v0  ;;  %v835_v63 = vadd.s32 56, %v1671_v25  ;;  %v1254_v0 = vsel %vm868_vm5, 1.0, %v1390_v46 }
  0x65   :  { %v380_v2 = vpop.permute.xlu2 %379 }
  0x66   :  { %v1636_v3 = vadd.f32 %v1633_v1, %v380_v2  ;;  %v1255_v2 = vsel %vm869_vm7, 1.0, %v1390_v46 }
  0x6d   :  { %v385_v4 = vpop.permute.xlu2 %384 }
  0x6e   :  { %v1639_v5 = vadd.f32 %v1633_v1, %v385_v4  ;;  %v1256_v4 = vsel %vm870_vm8, 1.0, %v1390_v46 }
  0x75   :  { %v400_v6 = vpop.permute.xlu2 %399 }
  0x76   :  { %v1642_v7 = vadd.f32 %v1633_v1, %v400_v6  ;;  %v851_v6 = vadd.s32 %v1684_v31, %v834_v58 }
  0x78   :  { %vm872_vm11 = vcmp.lt.s32.totalorder %v851_v6, 8 }
  0x79   :  { %v1258_v40 = vsel %vm872_vm11, 1.0, %v1390_v46 }
  0x7c   :  { %v370_v8 = vpop.permute.xlu1 %369  ;;  %v360_v9 = vpop.permute.xlu0 %359 }
  0x7d   :  { %v1645_v10 = vadd.f32 %v1633_v1, %v370_v8  ;;  %v1648_v11 = vadd.f32 %v1633_v1, %v360_v9  ;;  %v415_v12 = vpop.permute.xlu2 %414 }
  0x7e   :  { %v1651_v13 = vadd.f32 %v1633_v1, %v415_v12  ;;  %v852_v12 = vadd.s32 %v1684_v31, %v835_v63 }
  0x80   :  { %2351 = vst [vmem:[#allocation8_spill] sm:$0xff] %v1651_v13  ;;  %vm873_vm14 = vcmp.lt.s32.totalorder %v852_v12, 8  ;;  %v1261_v12 = vsel %vm875_vm3, 1.0, %v1390_v46 }
  0x81   :  { %v1259_v49 = vsel %vm873_vm14, 1.0, %v1390_v46  ;;  %v1817_v35 = vmul.f32 %v1709_v48, %v1261_v12 }
  0x84   :  { %v375_v14 = vpop.permute.xlu1 %374  ;;  %v365_v15 = vpop.permute.xlu0 %364 }
  0x85   :  { %v1654_v16 = vadd.f32 %v1633_v1, %v375_v14  ;;  %v1657_v17 = vadd.f32 %v1633_v1, %v365_v15  ;;  %v430_v18 = vpop.permute.xlu2 %429  ;;  %v1745_v14 = vmul.f32 %v1709_v48, %v1254_v0  ;;  %v1748_v15 = vmul.f32 %v1709_v48, %v1255_v2 }
  0x86   :  { %v1660_v19 = vadd.f32 %v1633_v1, %v430_v18  ;;  %v1751_v18 = vmul.f32 %v1709_v48, %v1256_v4 }
  0x88   :  { %2354 = vst [vmem:[#allocation11_spill] sm:$0xff] %v1751_v18 }
  0x8c   :  { %v395_v20 = vpop.permute.xlu1 %394  ;;  %v390_v21 = vpop.permute.xlu0 %389 }
  0x8d   :  { %v1663_v22 = vadd.f32 %v1633_v1, %v395_v20  ;;  %v1666_v23 = vadd.f32 %v1633_v1, %v390_v21  ;;  %v734_v37 = vpop.permute.xlu2 %733 }
  0x8e   :  { %vm779_vm4 = vcmp.eq.s32.totalorder %v734_v37, %v1705_v45 }
  0x8f   :  { %v1235_v62 = vsel %vm779_vm4, 1.0, %v1390_v46  ;;  %vm876_vm4 = vcmp.lt.s32.totalorder %v855_v51, 8 }
  0x90   :  { %v1740_v9 = vmul.f32 %v1235_v62, %v1720_v56 }
  0x94   :  { %v410_v26 = vpop.permute.xlu1 %409  ;;  %v405_v27 = vpop.permute.xlu0 %404 }
  0x95   :  { %v1679_v29 = vadd.f32 %v1633_v1, %v410_v26  ;;  %v1682_v30 = vadd.f32 %v1633_v1, %v405_v27  ;;  %v743_v60 = vpop.permute.xlu2 %742  ;;  %v836_v26 = vadd.s32 64, %v1671_v25 }
  0x96   :  { %vm782_vm9 = vcmp.eq.s32.totalorder %v743_v60, %v1705_v45  ;;  %v1788_v60 = vmul.f32 %v1709_v48, %v1259_v49 }
  0x97   :  { %v1238_v24 = vsel %vm782_vm9, 1.0, %v1390_v46  ;;  %v853_v43 = vadd.s32 %v1684_v31, %v836_v26 }
  0x98   :  { %v1774_v47 = vmul.f32 %v1238_v24, %v1751_v18  ;;  %2355 = vst [vmem:[#allocation12_spill] sm:$0xff] %v1788_v60 }
  0x99   :  { %vm874_vm0 = vcmp.lt.s32.totalorder %v853_v43, 8 }
  0x9a   :  { %v1260_v6 = vsel %vm874_vm0, 1.0, %v1390_v46 }
  0x9c   :  { %v425_v38 = vpop.permute.xlu1 %424  ;;  %v420_v39 = vpop.permute.xlu0 %419 }
  0x9d   :  { %v1693_v41 = vadd.f32 %v1633_v1, %v425_v38  ;;  %v1696_v42 = vadd.f32 %v1633_v1, %v420_v39  ;;  %v752_v38 = vpop.permute.xlu2 %751 }
  0x9e   :  { %vm785_vm15 = vcmp.eq.s32.totalorder %v752_v38, %v1705_v45 }
  0x9f   :  { %v1241_v2 = vsel %vm785_vm15, 1.0, %v1390_v46 }
  0xa0   :  { %v1809_v26 = vmul.f32 %v1241_v2, %v1788_v60 }
  0xa4   :  { %v435_v54 = vpop.permute.xlu0 %434  ;;  %v731_v55 = vpop.permute.xlu1 %730 }
  0xa5   :  { %v1725_v59 = vadd.f32 %v1633_v1, %v435_v54  ;;  %vm778_vm6 = vcmp.eq.s32.totalorder %v731_v55, %v1705_v45  ;;  %v850_v1 = vadd.s32 %v1684_v31, %v833_v57  ;;  %v1784_v55 = vmul.f32 %v1709_v48, %v1258_v40  ;;  %v761_v32 = vpop.permute.xlu2 %760 }
  0xa6   :  { %v1234_v61 = vsel %vm778_vm6, 1.0, %v1390_v46  ;;  %vm788_vm5 = vcmp.eq.s32.totalorder %v761_v32, %v1705_v45 }
  0xa7   :  { %2353 = vst [vmem:[#allocation10_spill] sm:$0xff] %v1725_v59  ;;  %v1737_v8 = vmul.f32 %v1234_v61, %v1716_v53  ;;  %vm871_vm10 = vcmp.lt.s32.totalorder %v850_v1, 8  ;;  %v839_v61 = vadd.s32 88, %v1671_v25 }
  0xa8   :  { %v1257_v39 = vsel %vm871_vm10, 1.0, %v1390_v46 }
  0xa9   :  { %v1109_v27 = vadd.f32 %v1740_v9, %v1737_v8  ;;  %v1781_v54 = vmul.f32 %v1709_v48, %v1257_v39 }
  0xac   :  { %v737_v20 = vpop.permute.xlu0 %736  ;;  %v740_v21 = vpop.permute.xlu1 %739 }
  0xad   :  { %vm780_vm12 = vcmp.eq.s32.totalorder %v737_v20, %v1705_v45  ;;  %vm781_vm13 = vcmp.eq.s32.totalorder %v740_v21, %v1705_v45  ;;  %v856_v20 = vadd.s32 %v1684_v31, %v839_v61  ;;  %v840_v21 = vadd.s32 96, %v1671_v25 }
  0xae   :  { %v1236_v33 = vsel %vm780_vm12, 1.0, %v1390_v46  ;;  %v1237_v34 = vsel %vm781_vm13, 1.0, %v1390_v46 }
  0xaf   :  { %v1764_v36 = vmul.f32 %v1236_v33, %v1745_v14  ;;  %v1767_v37 = vmul.f32 %v1237_v34, %v1748_v15  ;;  %v1814_v34 = vmul.f32 %v1709_v48, %v1260_v6  ;;  %vm877_vm6 = vcmp.lt.s32.totalorder %v856_v20, 8 }
  0xb0   :  { %v857_v43 = vadd.s32 %v1684_v31, %v840_v21  ;;  %v859_v6 = vadd.s32 %v1684_v31, %v842_v50  ;;  %v770_v21 = vpop.permute.xlu2 %769 }
  0xb1   :  { %v1110_v44 = vadd.f32 %v1109_v27, %v1764_v36  ;;  %v1262_v27 = vsel %vm876_vm4, 1.0, %v1390_v46  ;;  %vm791_vm14 = vcmp.eq.s32.totalorder %v770_v21, %v1705_v45 }
  0xb2   :  { %v1821_v40 = vmul.f32 %v1709_v48, %v1262_v27  ;;  %vm878_vm9 = vcmp.lt.s32.totalorder %v857_v43, 8  ;;  %vm880_vm12 = vcmp.lt.s32.totalorder %v859_v6, 8 }
  0xb3   :  { %v1111_v52 = vadd.f32 %v1110_v44, %v1767_v37  ;;  %v841_v44 = vadd.s32 104, %v1671_v25  ;;  %v1264_v27 = vsel %vm878_vm9, 1.0, %v1390_v46  ;;  %v1266_v6 = vsel %vm880_vm12, 1.0, %v1390_v46 }
  0xb4   :  { %v746_v57 = vpop.permute.xlu0 %745  ;;  %v749_v58 = vpop.permute.xlu1 %748 }
  0xb5   :  { %v1112_v62 = vadd.f32 %v1111_v52, %v1774_v47  ;;  %vm783_vm1 = vcmp.eq.s32.totalorder %v746_v57, %v1705_v45  ;;  %vm784_vm2 = vcmp.eq.s32.totalorder %v749_v58, %v1705_v45  ;;  %v1244_v57 = vsel %vm788_vm5, 1.0, %v1390_v46 }
  0xb6   :  { %v1239_v63 = vsel %vm783_vm1, 1.0, %v1390_v46  ;;  %v1240_v0 = vsel %vm784_vm2, 1.0, %v1390_v46  ;;  %v1842_v2 = vmul.f32 %v1244_v57, %v1821_v40 }
  0xb7   :  { %v1798_v4 = vmul.f32 %v1239_v63, %v1781_v54  ;;  %v1801_v1 = vmul.f32 %v1240_v0, %v1784_v55  ;;  %v858_v63 = vadd.s32 %v1684_v31, %v841_v44 }
  0xb9   :  { %v1113_v24 = vadd.f32 %v1112_v62, %v1798_v4  ;;  %v1263_v62 = vsel %vm877_vm6, 1.0, %v1390_v46  ;;  %vm879_vm10 = vcmp.lt.s32.totalorder %v858_v63, 8 }
  0xba   :  { %v1847_v20 = vmul.f32 %v1709_v48, %v1263_v62 }
  0xbb   :  { %v1114_v33 = vadd.f32 %v1113_v24, %v1801_v1 }
  0xbc   :  { %v755_v38 = vpop.permute.xlu0 %754  ;;  %v758_v39 = vpop.permute.xlu1 %757  ;;  %2356 = vst [vmem:[#allocation13_spill] sm:$0xff] %v1847_v20 }
  0xbd   :  { %v1115_v49 = vadd.f32 %v1114_v33, %v1809_v26  ;;  %vm786_vm7 = vcmp.eq.s32.totalorder %v755_v38, %v1705_v45  ;;  %vm787_vm8 = vcmp.eq.s32.totalorder %v758_v39, %v1705_v45  ;;  %v843_v33 = vadd.s32 120, %v1671_v25 }
  0xbe   :  { %v1242_v51 = vsel %vm786_vm7, 1.0, %v1390_v46  ;;  %v1243_v52 = vsel %vm787_vm8, 1.0, %v1390_v46  ;;  %v1265_v25 = vsel %vm879_vm10, 1.0, %v1390_v46 }
  0xbf   :  { %v1833_v58 = vmul.f32 %v1242_v51, %v1814_v34  ;;  %v1836_v61 = vmul.f32 %v1243_v52, %v1817_v35  ;;  %v1859_v52 = vmul.f32 %v1709_v48, %v1264_v27  ;;  %v860_v63 = vadd.s32 %v1684_v31, %v843_v33 }
  0xc0   :  { %v1882_v31 = vmul.f32 %v1709_v48, %v1266_v6 }
  0xc1   :  { %v1116_v0 = vadd.f32 %v1115_v49, %v1833_v58  ;;  %2358 = vst [vmem:[#allocation15_spill] sm:$0xff] %v1859_v52  ;;  %vm881_vm15 = vcmp.lt.s32.totalorder %v860_v63, 8 }
  0xc2   :  { %2361 = vst [vmem:[#allocation18_spill] sm:$0xff] %v1882_v31 }
  0xc3   :  { %v1117_v12 = vadd.f32 %v1116_v0, %v1836_v61 }
  0xc4   :  { %v764_v24 = vpop.permute.xlu0 %763  ;;  %v767_v32 = vpop.permute.xlu1 %766 }
  0xc5   :  { %v1118_v38 = vadd.f32 %v1117_v12, %v1842_v2  ;;  %vm789_vm11 = vcmp.eq.s32.totalorder %v764_v24, %v1705_v45  ;;  %v292_v39 = vpop.f32.mrf.mxu0  ;;  %v304_v43 = vpop.f32.mrf.mxu1  ;;  %vm790_vm13 = vcmp.eq.s32.totalorder %v767_v32, %v1705_v45  ;;  %v1874_v32 = vmul.f32 %v1709_v48, %v1265_v25 }
  0xc6   :  { %v1245_v44 = vsel %vm789_vm11, 1.0, %v1390_v46  ;;  %v456_v49 = vmul.f32 2.0, %v292_v39  ;;  %v460_v50 = vmul.f32 2.0, %v304_v43  ;;  %v1246_v0 = vsel %vm790_vm13, 1.0, %v1390_v46 }
  0xc7   :  { %v1856_v51 = vmul.f32 %v1245_v44, %v1847_v20  ;;  %2359 = vst [vmem:[#allocation16_spill] sm:$0xff] %v1874_v32  ;;  %v1878_v21 = vmul.f32 %v1246_v0, %v1859_v52 }
  0xc8   :  { %v472_v57 = vsub.f32 %v1648_v11, %v456_v49  ;;  %v476_v62 = vsub.f32 %v1636_v3, %v460_v50  ;;  %v1247_v11 = vsel %vm791_vm14, 1.0, %v1390_v46 }
  0xc9   :  { %2357 = vst [vmem:[#allocation14_spill] sm:$0xff] %v1856_v51  ;;  %v1119_v12 = vadd.f32 %v1118_v38, %v1856_v51  ;;  %v1887_v49 = vmul.f32 %v1247_v11, %v1874_v32 }
  0xca   :  { %v1869_v24 = vmax.f32 %v472_v57, 0.0  ;;  %v1871_v27 = vmax.f32 %v476_v62, 0.0  ;;  %2360 = vst [vmem:[#allocation17_spill] sm:$0xff] %v1878_v21  ;;  %v1267_v62 = vsel %vm881_vm15, 1.0, %v1390_v46 }
  0xcb   :  { %v316_v3 = vpop.f32.mrf.mxu2  ;;  %v1120_v44 = vadd.f32 %v1119_v12, %v1878_v21  ;;  %2362 = vst [vmem:[#allocation19_spill] sm:$0xff] %v1887_v49  ;;  %v328_v25 = vpop.f32.mrf.mxu3 }
  0xcc   :  { %1331 = vrsqrt.f32 %v1869_v24  ;;  %v773_v33 = vpop.permute.xlu0 %772  ;;  %v776_v38 = vpop.permute.xlu1 %775  ;;  %v464_v50 = vmul.f32 2.0, %v316_v3  ;;  %v1900_v3 = vmul.f32 %v1709_v48, %v1267_v62  ;;  %vm511_vm2 = vcmp.eq.f32.partialorder %v1869_v24, inf }
  0xcd   :  { %1333 = vrsqrt.f32 %v1871_v27  ;;  %v295_v39 = vpop.f32.mrf.mxu0  ;;  %v307_v43 = vpop.f32.mrf.mxu1  ;;  %vm792_vm0 = vcmp.eq.s32.totalorder %v773_v33, %v1705_v45  ;;  %vm793_vm1 = vcmp.eq.s32.totalorder %v776_v38, %v1705_v45  ;;  %vm513_vm3 = vcmp.eq.f32.partialorder %v1869_v24, 0.0 }
  0xce   :  { %v1248_v57 = vsel %vm792_vm0, 1.0, %v1390_v46  ;;  %v457_v0 = vmul.f32 2.0, %v295_v39  ;;  %v461_v63 = vmul.f32 2.0, %v307_v43  ;;  %v480_v12 = vsub.f32 %v1642_v7, %v464_v50  ;;  %2364 = vst [vmem:[#allocation21_spill] sm:$0xff] %v1900_v3 }
  0xcf   :  { %v1893_v6 = vmul.f32 %v1248_v57, %v1882_v31  ;;  %v1121_v39 = vadd.f32 %v1120_v44, %v1887_v49  ;;  %v1249_v13 = vsel %vm793_vm1, 1.0, %v1390_v46  ;;  %vm559_vm4 = vcmp.eq.f32.partialorder %v1871_v27, inf }
  0xd0   :  { %v473_v11 = vsub.f32 %v1657_v17, %v457_v0  ;;  %v477_v28 = vsub.f32 %v1639_v5, %v461_v63  ;;  %v1902_v59 = vmax.f32 %v480_v12, 0.0  ;;  %v1923_v63 = vmul.f32 %v1249_v13, %v1900_v3 }
  0xd1   :  { %2363 = vst [vmem:[#allocation20_spill] sm:$0xff] %v1893_v6  ;;  %v1122_v38 = vadd.f32 %v1121_v39, %v1893_v6  ;;  %v468_v5 = vmul.f32 2.0, %v328_v25  ;;  %vm561_vm9 = vcmp.eq.f32.partialorder %v1871_v27, 0.0 }
  0xd2   :  { %v1332_v33 = vpop.eup %1331  ;;  %v1907_v45 = vmax.f32 %v473_v11, 0.0  ;;  %v1909_v7 = vmax.f32 %v477_v28, 0.0  ;;  %1335 = vrsqrt.f32 %v1902_v59  ;;  %2365 = vst [vmem:[#allocation22_spill] sm:$0xff] %v1923_v63  ;;  %vm607_vm12 = vcmp.eq.f32.partialorder %v1902_v59, inf }
  0xd3   :  { %v1334_v43 = vpop.eup %1333  ;;  %v505_v57 = vmul.f32 %v1332_v33, %v1869_v24  ;;  %v319_v17 = vpop.f32.mrf.mxu2  ;;  %v1123_v46 = vadd.f32 %v1122_v38, %v1923_v63  ;;  %vm609_vm15 = vcmp.eq.f32.partialorder %v1902_v59, 0.0 }
  0xd4   :  { %v553_v48 = vmul.f32 %v1334_v43, %v1871_v27  ;;  %v465_v62 = vmul.f32 2.0, %v319_v17  ;;  %1337 = vrsqrt.f32 %v1907_v45  ;;  %v331_v13 = vpop.f32.mrf.mxu3  ;;  %vm523_vm5 = vcmp.eq.f32.partialorder %v1907_v45, inf }
  0xd5   :  { %v506_v50 = vmul.f32 %v1332_v33, %v505_v57  ;;  %v298_v12 = vpop.f32.mrf.mxu0  ;;  %v310_v11 = vpop.f32.mrf.mxu1  ;;  %1339 = vrsqrt.f32 %v1909_v7  ;;  %1124 = vadd.xlane.f32.xlu1 %v1123_v46  ;;  %v469_v17 = vmul.f32 2.0, %v331_v13  ;;  %vm525_vm6 = vcmp.eq.f32.partialorder %v1907_v45, 0.0 }
  0xd6   :  { %v554_v0 = vmul.f32 %v1334_v43, %v553_v48  ;;  %v481_v3 = vsub.f32 %v1682_v30, %v465_v62  ;;  %v458_v60 = vmul.f32 2.0, %v298_v12  ;;  %v462_v18 = vmul.f32 2.0, %v310_v11 }
  0xd7   :  { %v507_v44 = vmul.f32 0.5, %v506_v50  ;;  %v484_v30 = vsub.f32 %v1696_v42, %v468_v5  ;;  %vm571_vm8 = vcmp.eq.f32.partialorder %v1909_v7, inf  ;;  %vm573_vm11 = vcmp.eq.f32.partialorder %v1909_v7, 0.0 }
  0xd8   :  { %v555_v48 = vmul.f32 0.5, %v554_v0  ;;  %v1935_v39 = vpop.eup %1335  ;;  %v478_v62 = vsub.f32 %v1666_v23, %v462_v18  ;;  %v1959_v42 = vmax.f32 %v481_v3, 0.0  ;;  %v485_v3 = vsub.f32 %v1693_v41, %v469_v17 }
  0xd9   :  { %v508_v28 = vsub.f32 1.5, %v507_v44  ;;  %v474_v44 = vsub.f32 %v1645_v10, %v458_v60  ;;  %v601_v10 = vmul.f32 %v1935_v39, %v1902_v59  ;;  %v2369_v51 = vand.u32 2147483648, %v1909_v7 }
  0xda   :  { %v1338_v12 = vpop.eup %1337  ;;  %v556_v25 = vsub.f32 1.5, %v555_v48  ;;  %v1966_v46 = vmax.f32 %v478_v62, 0.0  ;;  %vm619_vm1 = vcmp.eq.f32.partialorder %v1959_v42, inf }
  0xdb   :  { %v509_v38 = vmul.f32 %v1332_v33, %v508_v28  ;;  %v322_v57 = vpop.f32.mrf.mxu2  ;;  %v1952_v63 = vpop.eup %1339  ;;  %v517_v23 = vmul.f32 %v1338_v12, %v1907_v45  ;;  %v1964_v5 = vmax.f32 %v474_v44, 0.0  ;;  %v1969_v28 = vmax.f32 %v484_v30, 0.0 }
  0xdc   :  { %v565_v60 = vmul.f32 %v1952_v63, %v1909_v7  ;;  %v466_v13 = vmul.f32 2.0, %v322_v57  ;;  %v557_v0 = vmul.f32 %v1334_v43, %v556_v25  ;;  %v602_v57 = vmul.f32 %v1935_v39, %v601_v10  ;;  %v334_v43 = vpop.f32.mrf.mxu3 }
  0xdd   :  { %v510_v18 = vmul.f32 %v509_v38, %v1869_v24  ;;  %v518_v48 = vmul.f32 %v1338_v12, %v517_v23  ;;  %1341 = vrsqrt.f32 %v1964_v5  ;;  %v514_v38 = vand.u32 2147483648, %v1869_v24 }
  0xde   :  { %v566_v33 = vmul.f32 %v1952_v63, %v565_v60  ;;  %1343 = vrsqrt.f32 %v1959_v42  ;;  %v482_v30 = vsub.f32 %v1679_v29, %v466_v13  ;;  %v558_v23 = vmul.f32 %v557_v0, %v1871_v27 }
  0xdf   :  { %v519_v44 = vmul.f32 0.5, %v518_v48  ;;  %v512_v62 = vsel %vm511_vm2, %v1869_v24, %v510_v18  ;;  %1345 = vrsqrt.f32 %v1966_v46  ;;  %v1987_v60 = vmax.f32 %v485_v3, 0.0  ;;  %v301_v48 = vpop.f32.mrf.mxu0 }
  0xe0   :  { %1347 = vrsqrt.f32 %v1969_v28  ;;  %v567_v18 = vmul.f32 0.5, %v566_v33  ;;  %v515_v10 = vsel %vm513_vm3, %v514_v38, %v512_v62  ;;  %v526_v29 = vand.u32 2147483648, %v1907_v45  ;;  %v313_v38 = vpop.f32.mrf.mxu1 }
  0xe1   :  { %v520_v25 = vsub.f32 1.5, %v519_v44  ;;  %v603_v44 = vmul.f32 0.5, %v602_v57  ;;  %v470_v13 = vmul.f32 2.0, %v334_v43  ;;  %v1999_v24 = vmax.f32 %v482_v30, 0.0 }
  0xe2   :  { %v2004_v57 = vsel %vm559_vm4, %v1871_v27, %v558_v23  ;;  %v568_v41 = vsub.f32 1.5, %v567_v18  ;;  %1349 = vrsqrt.f32 %v1987_v60  ;;  %v463_v31 = vmul.f32 2.0, %v313_v38 }
  0xe3   :  { %v521_v50 = vmul.f32 %v1338_v12, %v520_v25  ;;  %v1342_v17 = vpop.eup %1341  ;;  %v459_v12 = vmul.f32 2.0, %v301_v48  ;;  %v696_v25 = vadd.f32 1e-08, %v515_v10  ;;  %v325_v0 = vpop.f32.mrf.mxu2  ;;  %v604_v10 = vsub.f32 1.5, %v603_v44 }
  0xe4   :  { %v1995_v11 = vpop.eup %1343  ;;  %v529_v3 = vmul.f32 %v1342_v17, %v1964_v5  ;;  %vm535_vm7 = vcmp.eq.f32.partialorder %v1964_v5, inf  ;;  %1351 = vrsqrt.f32 %v1999_v24  ;;  %v538_v44 = vand.u32 2147483648, %v1964_v5 }
  0xe5   :  { %v522_v33 = vmul.f32 %v521_v50, %v1907_v45  ;;  %v1346_v62 = vpop.eup %1345  ;;  %v475_v48 = vsub.f32 %v1654_v16, %v459_v12  ;;  %v613_v18 = vmul.f32 %v1995_v11, %v1959_v42  ;;  %v337_v12 = vpop.f32.mrf.mxu3  ;;  %v569_v38 = vmul.f32 %v1952_v63, %v568_v41 }
  0xe6   :  { %v530_v43 = vmul.f32 %v1342_v17, %v529_v3  ;;  %v577_v30 = vmul.f32 %v1346_v62, %v1966_v46  ;;  %v2012_v6 = vpop.eup %1347  ;;  %vm537_vm10 = vcmp.eq.f32.partialorder %v1964_v5, 0.0  ;;  %v486_v21 = vsub.f32 %v1660_v19, %v470_v13 }
  0xe7   :  { %v524_v50 = vsel %vm523_vm5, %v1907_v45, %v522_v33  ;;  %v2020_v3 = vmax.f32 %v475_v48, 0.0  ;;  %v479_v45 = vsub.f32 %v1663_v22, %v463_v31  ;;  %v2029_v48 = vmul.f32 %v696_v25, %v696_v25 }
  0xe8   :  { %v527_v23 = vsel %vm525_vm6, %v526_v29, %v524_v50  ;;  %v531_v49 = vmul.f32 0.5, %v530_v43  ;;  %v578_v33 = vmul.f32 %v1346_v62, %v577_v30  ;;  %v467_v29 = vmul.f32 2.0, %v325_v0  ;;  %v2027_v32 = vpop.eup %1349 }
  0xe9   :  { %v697_v16 = vadd.f32 1e-08, %v527_v23  ;;  %v965_v50 = vsub.f32 0.2, %v696_v25  ;;  %v614_v23 = vmul.f32 %v1995_v11, %v613_v18  ;;  %1353 = vrsqrt.f32 %v2020_v3  ;;  %v2366_v25 = vld [vmem:[#allocation8_spill] sm:$0xff] }
  0xea   :  { %v532_v43 = vsub.f32 1.5, %v531_v49  ;;  %v579_v30 = vmul.f32 0.5, %v578_v33  ;;  %v605_v22 = vmul.f32 %v1935_v39, %v604_v10  ;;  %v471_v49 = vmul.f32 2.0, %v337_v12  ;;  %v2042_v33 = vpop.eup %1351 }
  0xeb   :  { %v966_v41 = vsub.f32 0.2, %v697_v16  ;;  %vm583_vm13 = vcmp.eq.f32.partialorder %v1966_v46, inf  ;;  %v2039_v0 = vmax.f32 %v479_v45, 0.0  ;;  %v483_v18 = vsub.f32 %v2366_v25, %v467_v29 }
  0xec   :  { %v533_v31 = vmul.f32 %v1342_v17, %v532_v43  ;;  %v580_v63 = vsub.f32 1.5, %v579_v30  ;;  %v981_v19 = vmax.f32 %v965_v50, 0.0  ;;  %v570_v13 = vmul.f32 %v569_v38, %v1909_v7  ;;  %v2367_v30 = vld [vmem:[#allocation10_spill] sm:$0xff] }
  0xed   :  { %v615_v17 = vmul.f32 0.5, %v614_v23  ;;  %v2046_v43 = vmax.f32 %v486_v21, 0.0  ;;  %1355 = vrsqrt.f32 %v2039_v0  ;;  %v2049_v12 = vmax.f32 %v483_v18, 0.0 }
  0xee   :  { %v534_v39 = vmul.f32 %v533_v31, %v1964_v5  ;;  %v581_v10 = vmul.f32 %v1346_v62, %v580_v63  ;;  %v606_v45 = vmul.f32 %v605_v22, %v1902_v59  ;;  %vm585_vm14 = vcmp.eq.f32.partialorder %v1966_v46, 0.0 }
  0xef   :  { %v586_v29 = vand.u32 2147483648, %v1966_v46  ;;  %v487_v50 = vsub.f32 %v2367_v30, %v471_v49  ;;  %v1354_v38 = vpop.eup %1353  ;;  %v982_v31 = vmax.f32 %v966_v41, 0.0  ;;  %v625_v62 = vmul.f32 %v2042_v33, %v1999_v24 }
  0xf0   :  { %v536_v21 = vsel %vm535_vm7, %v1964_v5, %v534_v39  ;;  %1357 = vrsqrt.f32 %v2049_v12  ;;  %v2062_v23 = vmul.f32 %v981_v19, %v981_v19  ;;  %v572_v22 = vsel %vm571_vm8, %v1909_v7, %v570_v13 }
  0xf1   :  { %v582_v63 = vmul.f32 %v581_v10, %v1966_v46  ;;  %v541_v49 = vmul.f32 %v1354_v38, %v2020_v3  ;;  %v2069_v41 = vmul.f32 %v697_v16, %v697_v16  ;;  %1359 = vrsqrt.f32 %v2046_v43 }
  0xf2   :  { %v2368_v25 = vand.u32 2147483648, %v1871_v27  ;;  %v616_v19 = vsub.f32 1.5, %v615_v17  ;;  %v539_v39 = vsel %vm537_vm10, %v538_v44, %v536_v21  ;;  %v550_v10 = vand.u32 2147483648, %v2020_v3 }
  0xf3   :  { %v542_v13 = vmul.f32 %v1354_v38, %v541_v49  ;;  %v2082_v30 = vmax.f32 %v487_v50, 0.0  ;;  %v1356_v16 = vpop.eup %1355  ;;  %v2084_v52 = vmul.f32 %v982_v31, %v982_v31  ;;  %v2090_v20 = vsel %vm573_vm11, %v2369_v51, %v572_v22 }
  0xf4   :  { %v2077_v18 = vsel %vm561_vm9, %v2368_v25, %v2004_v57  ;;  %v608_v27 = vsel %vm607_vm12, %v1902_v59, %v606_v45  ;;  %v626_v5 = vmul.f32 %v2042_v33, %v625_v62  ;;  %v584_v57 = vsel %vm583_vm13, %v1966_v46, %v582_v63 }
  0xf5   :  { %v543_v44 = vmul.f32 0.5, %v542_v13  ;;  %v589_v17 = vmul.f32 %v1356_v16, %v2039_v0  ;;  %v598_v50 = vand.u32 2147483648, %v2039_v0  ;;  %v2101_v21 = vadd.f32 1e-08, %v539_v39 }
  0xf6   :  { %v1358_v31 = vpop.eup %1357  ;;  %v610_v51 = vand.u32 2147483648, %v1902_v59  ;;  %v617_v7 = vmul.f32 %v1995_v11, %v616_v19  ;;  %v627_v22 = vmul.f32 0.5, %v626_v5  ;;  %vm547_vm0 = vcmp.eq.f32.partialorder %v2020_v3, inf }
  0xf7   :  { %v544_v45 = vsub.f32 1.5, %v543_v44  ;;  %v590_v62 = vmul.f32 %v1356_v16, %v589_v17  ;;  %v637_v49 = vmul.f32 %v1358_v31, %v2049_v12  ;;  %1361 = vrsqrt.f32 %v2082_v30  ;;  %v2108_v63 = vpop.eup %1359 }
  0xf8   :  { %v2112_v25 = vsel %vm585_vm14, %v586_v29, %v584_v57  ;;  %v2116_v39 = vsel %vm609_vm15, %v610_v51, %v608_v27  ;;  %v628_v11 = vsub.f32 1.5, %v627_v22  ;;  %v649_v19 = vmul.f32 %v2012_v6, %v1969_v28 }
  0xf9   :  { %v545_v13 = vmul.f32 %v1354_v38, %v544_v45  ;;  %v591_v5 = vmul.f32 0.5, %v590_v62  ;;  %v638_v44 = vmul.f32 %v1358_v31, %v637_v49  ;;  %vm549_vm2 = vcmp.eq.f32.partialorder %v2020_v3, 0.0 }
  0xfa   :  { %v618_v46 = vmul.f32 %v617_v7, %v1959_v42  ;;  %v650_v29 = vmul.f32 %v2012_v6, %v649_v19  ;;  %v661_v59 = vmul.f32 %v2027_v32, %v1987_v60  ;;  %vm621_vm3 = vcmp.eq.f32.partialorder %v1959_v42, 0.0 }
  0xfb   :  { %v592_v27 = vsub.f32 1.5, %v591_v5  ;;  %v629_v38 = vmul.f32 %v2042_v33, %v628_v11  ;;  %v639_v57 = vmul.f32 0.5, %v638_v44  ;;  %v546_v51 = vmul.f32 %v545_v13, %v2020_v3 }
  0xfc   :  { %vm595_vm4 = vcmp.eq.f32.partialorder %v2039_v0, inf  ;;  %v622_v22 = vand.u32 2147483648, %v1959_v42  ;;  %v651_v45 = vmul.f32 0.5, %v650_v29  ;;  %v662_v7 = vmul.f32 %v2027_v32, %v661_v59 }
  0xfd   :  { %v1362_v62 = vpop.eup %1361  ;;  %v593_v49 = vmul.f32 %v1356_v16, %v592_v27  ;;  %vm631_vm5 = vcmp.eq.f32.partialorder %v1999_v24, inf  ;;  %v640_v19 = vsub.f32 1.5, %v639_v57  ;;  %v673_v5 = vmul.f32 %v2108_v63, %v2046_v43 }
  0xfe   :  { %v620_v33 = vsel %vm619_vm1, %v1959_v42, %v618_v46  ;;  %vm633_vm6 = vcmp.eq.f32.partialorder %v1999_v24, 0.0  ;;  %v652_v11 = vsub.f32 1.5, %v651_v45  ;;  %v663_v13 = vmul.f32 0.5, %v662_v7 }
  0xff   :  { %vm597_vm7 = vcmp.eq.f32.partialorder %v2039_v0, 0.0  ;;  %v630_v44 = vmul.f32 %v629_v38, %v1999_v24  ;;  %v634_v16 = vand.u32 2147483648, %v1999_v24  ;;  %v641_v29 = vmul.f32 %v1358_v31, %v640_v19 }
 0x100   :  { %vm643_vm8 = vcmp.eq.f32.partialorder %v2049_v12, inf  ;;  %v548_v59 = vsel %vm547_vm0, %v2020_v3, %v546_v51  ;;  %vm645_vm9 = vcmp.eq.f32.partialorder %v2049_v12, 0.0  ;;  %v653_v46 = vmul.f32 %v2012_v6, %v652_v11 }
 0x101   :  { %v664_v27 = vsub.f32 1.5, %v663_v13  ;;  %v674_v57 = vmul.f32 %v2108_v63, %v673_v5  ;;  %v594_v45 = vmul.f32 %v593_v49, %v2039_v0  ;;  %v623_v38 = vsel %vm621_vm3, %v622_v22, %v620_v33 }
 0x102   :  { %v646_v31 = vand.u32 2147483648, %v2049_v12  ;;  %vm655_vm10 = vcmp.eq.f32.partialorder %v1969_v28, inf  ;;  %v642_v7 = vmul.f32 %v641_v29, %v2049_v12  ;;  %v654_v51 = vmul.f32 %v653_v46, %v1969_v28 }
 0x103   :  { %v665_v19 = vmul.f32 %v2027_v32, %v664_v27  ;;  %v675_v17 = vmul.f32 0.5, %v674_v57  ;;  %v551_v6 = vsel %vm549_vm2, %v550_v10, %v548_v59  ;;  %vm657_vm11 = vcmp.eq.f32.partialorder %v1969_v28, 0.0 }
 0x104   :  { %v658_v42 = vand.u32 2147483648, %v1969_v28  ;;  %v685_v22 = vmul.f32 %v1362_v62, %v2082_v30  ;;  %v632_v49 = vsel %vm631_vm5, %v1999_v24, %v630_v44  ;;  %vm667_vm12 = vcmp.eq.f32.partialorder %v1987_v60, inf }
 0x105   :  { %v666_v5 = vmul.f32 %v665_v19, %v1987_v60  ;;  %v676_v32 = vsub.f32 1.5, %v675_v17  ;;  %v596_v3 = vsel %vm595_vm4, %v2039_v0, %v594_v45  ;;  %vm669_vm13 = vcmp.eq.f32.partialorder %v1987_v60, 0.0 }
 0x106   :  { %v670_v10 = vand.u32 2147483648, %v1987_v60  ;;  %v686_v33 = vmul.f32 %v1362_v62, %v685_v22  ;;  %v2175_v11 = vadd.f32 1e-08, %v551_v6  ;;  %v644_v13 = vsel %vm643_vm8, %v2049_v12, %v642_v7 }
 0x107   :  { %v656_v44 = vsel %vm655_vm10, %v1969_v28, %v654_v51  ;;  %v677_v17 = vmul.f32 %v2108_v63, %v676_v32  ;;  %v635_v29 = vsel %vm633_vm6, %v634_v16, %v632_v49  ;;  %vm679_vm14 = vcmp.eq.f32.partialorder %v2046_v43, inf }
 0x108   :  { %vm681_vm15 = vcmp.eq.f32.partialorder %v2046_v43, 0.0  ;;  %v687_v59 = vmul.f32 0.5, %v686_v33  ;;  %v599_v46 = vsel %vm597_vm7, %v598_v50, %v596_v3  ;;  %v668_v27 = vsel %vm667_vm12, %v1987_v60, %v666_v5 }
 0x109   :  { %v678_v57 = vmul.f32 %v677_v17, %v2046_v43  ;;  %v682_v45 = vand.u32 2147483648, %v2046_v43  ;;  %v647_v24 = vsel %vm645_vm9, %v646_v31, %v644_v13  ;;  %v659_v63 = vsel %vm657_vm11, %v658_v42, %v656_v44 }
 0x10a   :  { %v688_v16 = vsub.f32 1.5, %v687_v59  ;;  %vm691_vm0 = vcmp.eq.f32.partialorder %v2082_v30, inf  ;;  %vm693_vm1 = vcmp.eq.f32.partialorder %v2082_v30, 0.0  ;;  %v694_v0 = vand.u32 2147483648, %v2082_v30 }
 0x10b   :  { %v680_v7 = vsel %vm679_vm14, %v2046_v43, %v678_v57  ;;  %v700_v50 = vadd.f32 1e-08, %v2077_v18  ;;  %v701_v51 = vadd.f32 1e-08, %v2090_v20  ;;  %v671_v12 = vsel %vm669_vm13, %v670_v10, %v668_v27 }
 0x10c   :  { %v689_v31 = vmul.f32 %v1362_v62, %v688_v16  ;;  %v702_v28 = vadd.f32 1e-08, %v2112_v25  ;;  %v703_v19 = vadd.f32 1e-08, %v599_v46  ;;  %v683_v6 = vsel %vm681_vm15, %v682_v45, %v680_v7 }
 0x10d   :  { %v704_v42 = vadd.f32 1e-08, %v2116_v39  ;;  %v705_v22 = vadd.f32 1e-08, %v623_v38  ;;  %v999_v49 = vmul.f32 %v2101_v21, %v2101_v21  ;;  %v706_v5 = vadd.f32 1e-08, %v635_v29 }
 0x10e   :  { %v690_v18 = vmul.f32 %v689_v31, %v2082_v30  ;;  %v707_v20 = vadd.f32 1e-08, %v647_v24  ;;  %v708_v32 = vadd.f32 1e-08, %v659_v63  ;;  %v1000_v60 = vmul.f32 %v2175_v11, %v2175_v11 }
 0x10f   :  { %v1001_v62 = vmul.f32 %v700_v50, %v700_v50  ;;  %v1002_v25 = vmul.f32 %v701_v51, %v701_v51  ;;  %v1014_v43 = vmul.f32 %v2069_v41, %v1740_v9  ;;  %v2218_v3 = vadd.f32 1e-08, %v671_v12 }
 0x110   :  { %v2220_v39 = vadd.f32 1e-08, %v683_v6  ;;  %v1003_v38 = vmul.f32 %v702_v28, %v702_v28  ;;  %v1004_v10 = vmul.f32 %v703_v19, %v703_v19  ;;  %v692_v33 = vsel %vm691_vm0, %v2082_v30, %v690_v18 }
 0x111   :  { %v1005_v13 = vmul.f32 %v704_v42, %v704_v42  ;;  %v1013_v44 = vmul.f32 %v2029_v48, %v1737_v8  ;;  %v1015_v17 = vmul.f32 %v999_v49, %v1764_v36  ;;  %v1006_v29 = vmul.f32 %v705_v22, %v705_v22 }
 0x112   :  { %2370 = vst [vmem:[#allocation8_spill] sm:$0xff] %v2220_v39  ;;  %v1007_v59 = vmul.f32 %v706_v5, %v706_v5  ;;  %v2228_v46 = vmul.f32 %v707_v20, %v707_v20  ;;  %v2230_v41 = vmul.f32 %v708_v32, %v708_v32  ;;  %v1016_v27 = vmul.f32 %v1000_v60, %v1767_v37 }
 0x113   :  { %v1017_v57 = vmul.f32 %v1001_v62, %v1774_v47  ;;  %v1018_v45 = vmul.f32 %v1002_v25, %v1798_v4  ;;  %v1029_v24 = vadd.f32 %v1014_v43, %v1013_v44  ;;  %v2237_v63 = vsel %vm693_vm1, %v694_v0, %v692_v33 }
 0x114   :  { %2371 = vst [vmem:[#allocation10_spill] sm:$0xff] %v2228_v46  ;;  %v1019_v48 = vmul.f32 %v1003_v38, %v1801_v1  ;;  %v1020_v16 = vmul.f32 %v1004_v10, %v1809_v26  ;;  %v968_v7 = vsub.f32 0.2, %v2175_v11  ;;  %v969_v31 = vsub.f32 0.2, %v700_v50 }
 0x115   :  { %2372 = vst [vmem:[#allocation23_spill] sm:$0xff] %v2230_v41  ;;  %v1030_v12 = vadd.f32 %v1029_v24, %v1015_v17  ;;  %v970_v6 = vsub.f32 0.2, %v701_v51  ;;  %v971_v49 = vsub.f32 0.2, %v702_v28  ;;  %v1021_v18 = vmul.f32 %v1005_v13, %v1833_v58 }
 0x116   :  { %v972_v60 = vsub.f32 0.2, %v703_v19  ;;  %v973_v62 = vsub.f32 0.2, %v704_v42  ;;  %v974_v25 = vsub.f32 0.2, %v705_v22  ;;  %v1022_v33 = vmul.f32 %v1006_v29, %v1836_v61 }
 0x117   :  { %v1031_v43 = vadd.f32 %v1030_v12, %v1016_v27  ;;  %v975_v44 = vsub.f32 0.2, %v706_v5  ;;  %v976_v30 = vsub.f32 0.2, %v707_v20  ;;  %v977_v0 = vsub.f32 0.2, %v708_v32 }
 0x118   :  { %v978_v38 = vsub.f32 0.2, %v2218_v3  ;;  %v979_v10 = vsub.f32 0.2, %v2220_v39  ;;  %v2373_v11 = vsub.f32 0.2, %v2101_v21  ;;  %v1023_v29 = vmul.f32 %v1007_v59, %v1842_v2 }
 0x119   :  { %v1032_v51 = vadd.f32 %v1031_v43, %v1017_v57  ;;  %v984_v28 = vmax.f32 %v968_v7, 0.0  ;;  %v985_v17 = vmax.f32 %v969_v31, 0.0  ;;  %v986_v13 = vmax.f32 %v970_v6, 0.0 }
 0x11a   :  { %v983_v50 = vmax.f32 %v2373_v11, 0.0  ;;  %v987_v19 = vmax.f32 %v971_v49, 0.0  ;;  %v988_v42 = vmax.f32 %v972_v60, 0.0  ;;  %v989_v22 = vmax.f32 %v973_v62, 0.0 }
 0x11b   :  { %v990_v27 = vmax.f32 %v974_v25, 0.0  ;;  %v1033_v5 = vadd.f32 %v1032_v51, %v1018_v45  ;;  %v991_v20 = vmax.f32 %v975_v44, 0.0  ;;  %v992_v32 = vmax.f32 %v976_v30, 0.0 }
 0x11c   :  { %v993_v24 = vmax.f32 %v977_v0, 0.0  ;;  %v994_v12 = vmax.f32 %v978_v38, 0.0  ;;  %v995_v41 = vmax.f32 %v979_v10, 0.0  ;;  %v1055_v39 = vmul.f32 %v983_v50, %v983_v50 }
 0x11d   :  { %v1034_v46 = vadd.f32 %v1033_v5, %v1019_v48  ;;  %v1056_v21 = vmul.f32 %v984_v28, %v984_v28  ;;  %v1057_v11 = vmul.f32 %v985_v17, %v985_v17  ;;  %v1058_v57 = vmul.f32 %v986_v13, %v986_v13  ;;  %v2387_v28 = vld [vmem:[#allocation13_spill] sm:$0xff]  ;;  %v2390_v13 = vld [vmem:[#allocation15_spill] sm:$0xff] }
 0x11e   :  { %v1059_v7 = vmul.f32 %v987_v19, %v987_v19  ;;  %v1060_v31 = vmul.f32 %v988_v42, %v988_v42  ;;  %v1061_v6 = vmul.f32 %v989_v22, %v989_v22  ;;  %v1062_v49 = vmul.f32 %v990_v27, %v990_v27  ;;  %v2391_v19 = vld [vmem:[#allocation17_spill] sm:$0xff]  ;;  %v2394_v42 = vld [vmem:[#allocation19_spill] sm:$0xff]  ;;  %v2397_v27 = vld [vmem:[#allocation20_spill] sm:$0xff] }
 0x11f   :  { %v1035_v60 = vadd.f32 %v1034_v46, %v1020_v16  ;;  %v1063_v62 = vmul.f32 %v991_v20, %v991_v20  ;;  %v1064_v25 = vmul.f32 %v992_v32, %v992_v32  ;;  %v1065_v45 = vmul.f32 %v993_v24, %v993_v24  ;;  %v2399_v20 = vld [vmem:[#allocation10_spill] sm:$0xff] }
 0x120   :  { %v1066_v43 = vmul.f32 %v994_v12, %v994_v12  ;;  %v1067_v44 = vmul.f32 %v995_v41, %v995_v41  ;;  %v2374_v59 = vsub.f32 %v1716_v53, %v1737_v8  ;;  %v2375_v48 = vsub.f32 %v1720_v56, %v1740_v9  ;;  %v2378_v41 = vld [vmem:[#allocation11_spill] sm:$0xff] }
 0x121   :  { %v1036_v38 = vadd.f32 %v1035_v60, %v1021_v18  ;;  %v2376_v10 = vsub.f32 %v1745_v14, %v1764_v36  ;;  %v2377_v16 = vsub.f32 %v1748_v15, %v1767_v37  ;;  %v2379_v51 = vsub.f32 %v2378_v41, %v1774_v47 }
 0x122   :  { %v1069_v30 = vmul.f32 %v2062_v23, %v2374_v59  ;;  %v1070_v0 = vmul.f32 %v2084_v52, %v2375_v48  ;;  %v2380_v8 = vsub.f32 %v1781_v54, %v1798_v4  ;;  %v2381_v56 = vsub.f32 %v1784_v55, %v1801_v1  ;;  %v2382_v52 = vld [vmem:[#allocation12_spill] sm:$0xff]  ;;  %v2388_v55 = vld [vmem:[#allocation14_spill] sm:$0xff] }
 0x123   :  { %v1071_v46 = vmul.f32 %v1055_v39, %v2376_v10  ;;  %v1072_v50 = vmul.f32 %v1056_v21, %v2377_v16  ;;  %v1073_v53 = vmul.f32 %v1057_v11, %v2379_v51  ;;  %v2383_v14 = vsub.f32 %v2382_v52, %v1809_v26  ;;  %v2401_v11 = vld [vmem:[#allocation23_spill] sm:$0xff] }
 0x124   :  { %v1074_v23 = vmul.f32 %v1058_v57, %v2380_v8  ;;  %v1075_v9 = vmul.f32 %v1059_v7, %v2381_v56  ;;  %v2384_v15 = vsub.f32 %v1814_v34, %v1833_v58  ;;  %v1037_v39 = vadd.f32 %v1036_v38, %v1022_v33  ;;  %v2393_v33 = vld [vmem:[#allocation16_spill] sm:$0xff]  ;;  %v2403_v56 = vld [vmem:[#allocation21_spill] sm:$0xff] }
 0x125   :  { %v1076_v36 = vmul.f32 %v1060_v31, %v2383_v14  ;;  %v2385_v47 = vsub.f32 %v1817_v35, %v1836_v61  ;;  %v2386_v54 = vsub.f32 %v1821_v40, %v1842_v2  ;;  %v2389_v1 = vsub.f32 %v2387_v28, %v2388_v55  ;;  %v2396_v61 = vld [vmem:[#allocation18_spill] sm:$0xff] }
 0x126   :  { %v1077_v37 = vmul.f32 %v1061_v6, %v2384_v15  ;;  %v1010_v26 = vmul.f32 %v2218_v3, %v2218_v3  ;;  %v2392_v34 = vsub.f32 %v2390_v13, %v2391_v19  ;;  %v2395_v22 = vsub.f32 %v2393_v33, %v2394_v42  ;;  %v2400_v3 = vld [vmem:[#allocation8_spill] sm:$0xff] }
 0x127   :  { %v1078_v18 = vmul.f32 %v1062_v49, %v2385_v47  ;;  %v1079_v4 = vmul.f32 %v1063_v62, %v2386_v54  ;;  %v1080_v17 = vmul.f32 %v1064_v25, %v2389_v1  ;;  %v2398_v5 = vsub.f32 %v2396_v61, %v2397_v27  ;;  %v2404_v61 = vld [vmem:[#allocation9_spill] sm:$0xff] }
 0x128   :  { %v1081_v58 = vmul.f32 %v1065_v45, %v2392_v34  ;;  %v1082_v35 = vmul.f32 %v1066_v43, %v2395_v22  ;;  %v711_v2 = vadd.f32 1e-08, %v2237_v63  ;;  %v1024_v32 = vmul.f32 %v2399_v20, %v2388_v55  ;;  %v2402_v43 = vld [vmem:[#allocation22_spill] sm:$0xff] }
 0x129   :  { %v1083_v40 = vmul.f32 %v1067_v44, %v2398_v5  ;;  %v1038_v24 = vadd.f32 %v1037_v39, %v1023_v29  ;;  %v1085_v12 = vadd.f32 %v1070_v0, %v1069_v30  ;;  %v1011_v21 = vmul.f32 %v2400_v3, %v2400_v3 }
 0x12a   :  { %v1025_v57 = vmul.f32 %v2401_v11, %v2391_v19  ;;  %v1012_v6 = vmul.f32 %v711_v2, %v711_v2  ;;  %v1026_v49 = vmul.f32 %v1010_v26, %v2394_v42  ;;  %v980_v38 = vsub.f32 0.2, %v711_v2 }
 0x12b   :  { %v1039_v7 = vadd.f32 %v1038_v24, %v1024_v32  ;;  %v1086_v31 = vadd.f32 %v1085_v12, %v1071_v46  ;;  %v1027_v63 = vmul.f32 %v1011_v21, %v2397_v27  ;;  %v964_v52 = vsub.f32 %v2403_v56, %v2402_v43 }
 0x12c   :  { %v1028_v29 = vmul.f32 %v1012_v6, %v2402_v43  ;;  %v996_v16 = vmax.f32 %v980_v38, 0.0  ;;  %vm1140_vm2 = vcmp.eq.s32.totalorder %v2404_v61, 2  ;;  %vm1139_vm3 = vcmp.eq.s32.totalorder %v2404_v61, 1 }
 0x12d   :  { %v1040_v60 = vadd.f32 %v1039_v7, %v1025_v57  ;;  %v1087_v62 = vadd.f32 %v1086_v31, %v1072_v50  ;;  %vm1138_vm4 = vcmp.eq.s32.totalorder %v2404_v61, 0 }
 0x12e   :  { %v1068_v8 = vmul.f32 %v996_v16, %v996_v16 }
 0x12f   :  { %v1041_v25 = vadd.f32 %v1040_v60, %v1026_v49  ;;  %v1088_v45 = vadd.f32 %v1087_v62, %v1073_v53 }
 0x130   :  { %v1084_v14 = vmul.f32 %v1068_v8, %v964_v52 }
 0x131   :  { %v1042_v44 = vadd.f32 %v1041_v25, %v1027_v63  ;;  %v1089_v59 = vadd.f32 %v1088_v45, %v1074_v23 }
 0x133   :  { %v1043_v30 = vadd.f32 %v1042_v44, %v1028_v29  ;;  %v1090_v48 = vadd.f32 %v1089_v59, %v1075_v9 }
 0x135   :  { %1044 = vadd.xlane.f32.xlu2 %v1043_v30  ;;  %v1091_v0 = vadd.f32 %v1090_v48, %v1076_v36 }
 0x137   :  { %v1092_v10 = vadd.f32 %v1091_v0, %v1077_v37 }
 0x139   :  { %v1093_v46 = vadd.f32 %v1092_v10, %v1078_v18 }
 0x13b   :  { %v1094_v41 = vadd.f32 %v1093_v46, %v1079_v4 }
 0x13d   :  { %v1095_v51 = vadd.f32 %v1094_v41, %v1080_v17 }
 0x13f   :  { %v1096_v50 = vadd.f32 %v1095_v51, %v1081_v58 }
 0x141   :  { %v1097_v53 = vadd.f32 %v1096_v50, %v1082_v35 }
 0x143   :  { %v1098_v15 = vadd.f32 %v1097_v53, %v1083_v40 }
 0x145   :  { %v1099_v39 = vadd.f32 %v1098_v15, %v1084_v14 }
 0x147   :  { %1100 = vadd.xlane.f32.xlu0 %v1099_v39 }
 0x148   :  { %v1125_v54 = vpop.xlane.xlu1 %1124 }
 0x149   :  { %v1126_v28 = vrot.slane %v1125_v54, 4 }
 0x14b   :  { %v1127_v55 = vadd.f32 %v1126_v28, %v1125_v54 }
 0x14d   :  { %v1128_v1 = vrot.slane %v1127_v55, 2 }
 0x14f   :  { %v1129_v19 = vadd.f32 %v1128_v1, %v1127_v55 }
 0x151   :  { %v1130_v33 = vrot.slane %v1129_v19, 1 }
 0x153   :  { %v1131_v35 = vadd.f32 %v1130_v33, %v1129_v19 }
 0x1a8   :  { %v1045_v23 = vpop.xlane.xlu2 %1044 }
 0x1a9   :  { %v1046_v9 = vrot.slane %v1045_v23, 4 }
 0x1ab   :  { %v1047_v47 = vadd.f32 %v1046_v9, %v1045_v23 }
 0x1ad   :  { %v1048_v36 = vrot.slane %v1047_v47, 2 }
 0x1af   :  { %v1049_v37 = vadd.f32 %v1048_v36, %v1047_v47 }
 0x1b1   :  { %v1050_v18 = vrot.slane %v1049_v37, 1 }
 0x1b3   :  { %v1051_v4 = vadd.f32 %v1050_v18, %v1049_v37 }
 0x1b5   :  { %1317 = vpush %v1051_v4 }
 0x1ba   :  { %v1101_v17 = vpop.xlane.xlu0 %1100 }
 0x1bb   :  { %v1102_v26 = vrot.slane %v1101_v17, 4 }
 0x1bd   :  { %v1103_v13 = vadd.f32 %v1102_v26, %v1101_v17 }
 0x1bf   :  { %v1104_v34 = vrot.slane %v1103_v13, 2 }
 0x1c1   :  { %v1105_v58 = vadd.f32 %v1104_v34, %v1103_v13 }
 0x1c3   :  { %v1106_v42 = vrot.slane %v1105_v58, 1 }
 0x1c5   :  { %v1107_v22 = vadd.f32 %v1106_v42, %v1105_v58 }
 0x1c7   :  { %1319 = vpush %v1107_v22 }
 0x1c8   :  { %1321 = vpush %v1131_v35 }
 0x1e6   :  { %s1318_s21 = spop %1317 }
 0x1e7   :  { %s1135_s22 = smul.f32 %s1318_s21, %s1134_s6 }
 0x1e9   :  { %v1145_v2 = vstv %s1135_s22 }
 0x1f8   :  { %s1320_s23 = spop %1319 }
 0x1f9   :  { %s1136_s24 = smul.f32 %s1320_s23, %s1134_s6  ;;  %s1322_s25 = spop %1321 }
 0x1fa   :  { %s1137_s26 = smul.f32 %s1322_s25, %s1134_s6 }
 0x1fb   :  { %v1143_v27 = vstv %s1136_s24 }
 0x1fc   :  { %v1141_v5 = vstv %s1137_s26 }
 0x1fd   :  { %v1142_v40 = vsel %vm1140_vm2, %v1141_v5, 0.0 }
 0x1fe   :  { %v1144_v20 = vsel %vm1139_vm3, %v1143_v27, %v1142_v40 }
 0x1ff   :  { %v1146_v32 = vsel %vm1138_vm4, %v1145_v2, %v1144_v20 }
 0x200   :  { %1147 = vst [vmem:[#allocation5] sm:$0xff] %v1146_v32 }
 0x201   :  { %1158 = dma.vmem_to_hbm [thread:$0]  %s1154_s28, 128, %s1156_s4, [#allocation6]  }
 0x202   :  { %1387 = dma.done.wait [#allocation6], 128  }
 0x203   :  { %1388 = vsyncadd [#allocation6], 4294967168 }
 0x204   :  { %1163 = vsyncpa [#allocation6], 1 }

</bundles_post_ra>
